<compile_context>
chip_gen: v5e
topology: v5e:2x2
jax: 0.10.0
libtpu: 0.0.40
codegen_flags: <defaults>
</compile_context>

<pallas_src>
import jax
import jax.numpy as jnp
from jax.experimental import pallas as pl
from jax.experimental.pallas import tpu as pltpu

# ---------------- small model configuration (consistent with EEGNetModel) ----------------
BATCH = 2
CHANS = 8          # chans
CLASSES = 3        # classes
TIME = 128         # time_points
TEMP_K = 16        # temp_kernel
F1 = 8             # f1
D = 2              # d
F2 = 16            # f2 (must equal d*f1 so block3's grouped conv is depthwise)
PK1 = 8            # pk1
PK2 = 4            # pk2
K3 = 16            # hard-coded temporal kernel width in block3
BN_EPS = 1e-5

C2 = D * F1                       # 16
T1 = TIME // PK1                  # 16
T2 = T1 // PK2                    # 4
LINEAR = (TIME // (PK1 * PK2)) * F2
L1 = (TEMP_K - 1) // 2            # 7  (PyTorch 'same' left pad)
L3 = (K3 - 1) // 2                # 7
BC = BATCH * CHANS                # 16
XPAD_W = 2 * TIME                 # x placed at lane offset TIME//2
YPAD_W = 3 * TIME                 # y2 placed at lane offset TIME (aligned store)
assert C2 == F2, "block3 grouped conv requires d*f1 == f2"
assert LINEAR == F2 * T2


def _elu(x):
    return jnp.where(x > 0, x, jnp.exp(jnp.minimum(x, 0.0)) - 1.0)


# ------------------------------ Pallas kernel (whole batch, single invocation) ----------
def eegnet_kernel(xpad_ref, w12big_ref, biases_ref, w3rows_ref, poolmat_ref,
                  w4big_ref, wfc_ref, out_ref, y1s_ref, y2pad_ref):
    # ---- block1: 16 shifted temporal-tap copies of x (rows (tap j, batch, chan)) ----
    # xpad holds x at lane offset TIME//2 with zeros elsewhere, so each shifted copy is a
    # static lane slice: no band matrices, no roll, no edge masks.
    for j in range(TEMP_K):
        lo = TIME // 2 + j - L1
        y1s_ref[j * BC:(j + 1) * BC, :] = (
            xpad_ref[:, lo:lo + TIME].astype(jnp.bfloat16))

    # ---- block1 temporal conv + BN1 + block2 depthwise spatial conv + BN2: one matmul ----
    y2 = jnp.dot(w12big_ref[...], y1s_ref[...],
                 preferred_element_type=jnp.float32)               # (2*C2, TIME), rows (b, o)
    y2 = _elu(y2 + biases_ref[:, 0:1])                             # folded BN bias, then ELU

    # ---- block3 depthwise temporal conv ('same'), applied PRE-pool with PK1-dilated taps ----
    # pool(conv_dilated(y2)) == conv(pool(y2)) because the shifts are multiples of PK1 and
    # the zero padding matches the 'same' padding of the pooled sequence.
    y2pad_ref[...] = jnp.zeros((BATCH * C2, YPAD_W), jnp.float32)
    y2pad_ref[:, TIME:2 * TIME] = y2
    w3rows = w3rows_ref[...]                                       # (2*C2, K3)
    z = jnp.zeros_like(y2)
    for j in range(K3):
        lo = TIME + PK1 * (j - L3)
        z = z + w3rows[:, j:j + 1] * y2pad_ref[:, lo:lo + TIME]    # VPU FMAs

    # ---- block2 AvgPool(pk1): one small MXU matmul ----
    y3 = jnp.dot(z.astype(jnp.bfloat16), poolmat_ref[...],
                 preferred_element_type=jnp.float32)               # (2*C2, T1)

    # ---- block3 pointwise 1x1 conv + BN3 + ELU (tiny matmul, kept f32) ----
    y4 = _elu(jnp.dot(w4big_ref[...], y3, preferred_element_type=jnp.float32)
              + biases_ref[:, 1:2])                                # (2*F2, T1), rows (b, f2)

    # ---- AvgPool(pk2) + flatten + Linear (pool folded into wfc in the wrapper), f32 ----
    partial = jnp.sum(wfc_ref[...] * y4[None, :, :], axis=2)       # (CLASSES, 2*F2)
    outs = [jnp.sum(partial[:, b * F2:(b + 1) * F2], axis=1, keepdims=True)
            for b in range(BATCH)]
    out_ref[...] = jnp.concatenate(outs, axis=1)                   # (CLASSES, BATCH)


# ------------------------------ constant folding (wrapper-side, done once) --------------
def fold_params(p):
    f32, bf16 = jnp.float32, jnp.bfloat16
    w1, s1, b1 = p["w1"], p["s1"], p["b1"]
    w2, s2, b2 = p["w2"], p["s2"], p["b2"]
    w3, w4 = p["w3"], p["w4"]
    s3, b3 = p["s3"], p["b3"]
    wfc, bfc = p["wfc"], p["bfc"]

    w2flat = w2.reshape(C2, CHANS)                                  # row o = f*D + m
    f_of_o = jnp.arange(C2) // D
    eye_b = jnp.eye(BATCH, dtype=f32)

    # fused block1 taps + block2 spatial depthwise conv + BN1/BN2 scales.
    # rows (b_out, o); columns (tap j, b_in, c) -- exactly the y1s scratch row order.
    w12 = (s2[:, None, None] * s1[f_of_o][:, None, None]
           * w1[f_of_o][:, :, None] * w2flat[:, None, :])           # (C2, TEMP_K, CHANS)
    w12big = jnp.einsum("ab,ojc->aojbc", eye_b, w12).reshape(
        BATCH * C2, TEMP_K * BATCH * CHANS).astype(bf16)

    # BN biases: push BN1 bias through the spatial conv + BN2; tile over batch rows.
    bias2 = s2 * b1[f_of_o] * jnp.sum(w2flat, axis=1) + b2           # (C2,)
    biases = jnp.stack([jnp.tile(bias2, BATCH),
                        jnp.tile(b3, BATCH)], axis=1).astype(f32)    # (2*C2, 2)

    # block3 depthwise temporal taps, per (b, o) row.
    w3rows = jnp.tile(w3, (BATCH, 1)).astype(f32)                    # (2*C2, K3)

    # AvgPool(pk1) matrix (exact 1/8 in bf16).
    poolmat = (((jnp.arange(TIME)[:, None] // PK1)
                == jnp.arange(T1)[None, :]).astype(f32) / PK1).astype(bf16)   # (TIME, T1)

    # block3 pointwise conv with BN3 scale folded, block-diagonal over batch.
    w4big = jnp.einsum("ab,fo->afbo", eye_b, w4 * s3[:, None]).reshape(
        BATCH * F2, BATCH * C2).astype(f32)

    # AvgPool(pk2) folded into the FC weight; rows laid out as (b, f2).
    wfc3 = wfc.reshape(CLASSES, F2, T2)
    wfc_t1 = wfc3[:, :, jnp.arange(T1) // PK2] / PK2                 # (CLASSES, F2, T1)
    wfc_rows = jnp.tile(wfc_t1, (1, BATCH, 1)).astype(f32)           # (CLASSES, 2*F2, T1)

    return dict(w12big=w12big, biases=biases, w3rows=w3rows, poolmat=poolmat,
                w4big=w4big, wfc_rows=wfc_rows, bfc=bfc)


# ------------------------------ wrapper ------------------------------
def eegnet_forward(x_nchw, folded):
    assert x_nchw.shape[0] == BATCH
    x2d = x_nchw[:, 0, :, :].reshape(BATCH * CHANS, TIME).astype(jnp.float32)
    # zero-pad x along lanes once so the kernel's shifted-tap reads are plain slices
    xpad = jnp.zeros((BATCH * CHANS, XPAD_W), jnp.float32)
    xpad = xpad.at[:, TIME // 2:TIME // 2 + TIME].set(x2d)

    out_cb = pl.pallas_call(
        eegnet_kernel,
        out_shape=jax.ShapeDtypeStruct((CLASSES, BATCH), jnp.float32),
        grid_spec=pltpu.PrefetchScalarGridSpec(
            num_scalar_prefetch=0,
            grid=(1,),
            in_specs=[
                pl.BlockSpec((BC, XPAD_W), lambda i: (0, 0)),                      # xpad
                pl.BlockSpec((BATCH * C2, TEMP_K * BC), lambda i: (0, 0)),         # w12big (bf16)
                pl.BlockSpec((BATCH * C2, 2), lambda i: (0, 0)),                   # biases
                pl.BlockSpec((BATCH * C2, K3), lambda i: (0, 0)),                  # w3rows
                pl.BlockSpec((TIME, T1), lambda i: (0, 0)),                        # poolmat (bf16)
                pl.BlockSpec((BATCH * F2, BATCH * C2), lambda i: (0, 0)),          # w4big
                pl.BlockSpec((CLASSES, BATCH * F2, T1), lambda i: (0, 0, 0)),      # wfc_rows
            ],
            out_specs=pl.BlockSpec((CLASSES, BATCH), lambda i: (0, 0)),
            scratch_shapes=[
                pltpu.VMEM((TEMP_K * BC, TIME), jnp.bfloat16),                     # shifted-tap stack
                pltpu.VMEM((BATCH * C2, YPAD_W), jnp.float32),                     # padded y2 for conv3
            ],
        ),
        compiler_params=pltpu.CompilerParams(dimension_semantics=("arbitrary",)),
    )(xpad, folded["w12big"], folded["biases"], folded["w3rows"],
      folded["poolmat"], folded["w4big"], folded["wfc_rows"])

    return out_cb.T + folded["bfc"][None, :]                  # (BATCH, CLASSES)


# ------------------------------ plain-JAX f32 reference ------------------------------
def eegnet_ref(x_nchw, p):
    B = x_nchw.shape[0]
    x = x_nchw[:, 0]                                          # (B, C, T)
    l1 = (TEMP_K - 1) // 2
    xp = jnp.pad(x, ((0, 0), (0, 0), (l1, TEMP_K - 1 - l1)))
    y1 = jnp.zeros((B, F1, CHANS, TIME), jnp.float32)
    for j in range(TEMP_K):
        y1 = y1 + p["w1"][:, j][None, :, None, None] * xp[:, None, :, j:j + TIME]
    y1 = y1 * p["s1"][None, :, None, None] + p["b1"][None, :, None, None]

    y2 = jnp.einsum("fmc,bfct->bfmt", p["w2"], y1).reshape(B, C2, TIME)
    y2 = y2 * p["s2"][None, :, None] + p["b2"][None, :, None]
    y2 = jnp.where(y2 > 0, y2, jnp.exp(jnp.minimum(y2, 0.0)) - 1.0)
    y2 = y2.reshape(B, C2, T1, PK1).mean(-1)

    l3 = (K3 - 1) // 2
    y2p = jnp.pad(y2, ((0, 0), (0, 0), (l3, K3 - 1 - l3)))
    y3 = jnp.zeros((B, C2, T1), jnp.float32)
    for j in range(K3):
        y3 = y3 + p["w3"][:, j][None, :, None] * y2p[:, :, j:j + T1]
    y4 = jnp.einsum("oc,bct->bot", p["w4"], y3)
    y4 = y4 * p["s3"][None, :, None] + p["b3"][None, :, None]
    y4 = jnp.where(y4 > 0, y4, jnp.exp(jnp.minimum(y4, 0.0)) - 1.0)
    y5 = y4.reshape(B, F2, T2, PK2).mean(-1)
    flat = y5.reshape(B, F2 * T2)
    return flat @ p["wfc"].T + p["bfc"][None, :]


# ------------------------------ deterministic parameter init ------------------------------
def _renorm(w, maxnorm):
    # torch.renorm(p=2, dim=0): per-row L2 renorm
    n = jnp.sqrt(jnp.sum(w * w, axis=1, keepdims=True))
    return jnp.where(n > maxnorm, w * (maxnorm / (n + 1e-7)), w)


def init_params(key):
    ks = jax.random.split(key, 20)
    nrm = lambda k, s, sc=0.1: sc * jax.random.normal(k, s, jnp.float32)

    w1 = nrm(ks[0], (F1, TEMP_K), 0.3)
    g1, be1 = 1.0 + nrm(ks[1], (F1,)), nrm(ks[2], (F1,))
    m1, v1 = nrm(ks[3], (F1,)), 0.5 + jnp.abs(nrm(ks[4], (F1,)))
    s1 = g1 / jnp.sqrt(v1 + BN_EPS)

    w2 = _renorm(nrm(ks[5], (C2, CHANS), 0.5), 1.0).reshape(F1, D, CHANS)   # max_norm1
    g2, be2 = 1.0 + nrm(ks[6], (C2,)), nrm(ks[7], (C2,))
    m2, v2 = nrm(ks[8], (C2,)), 0.5 + jnp.abs(nrm(ks[9], (C2,)))
    s2 = g2 / jnp.sqrt(v2 + BN_EPS)

    w3 = nrm(ks[10], (C2, K3), 0.3)
    w4 = nrm(ks[11], (F2, C2), 0.3)
    g3, be3 = 1.0 + nrm(ks[12], (F2,)), nrm(ks[13], (F2,))
    m3, v3 = nrm(ks[14], (F2,)), 0.5 + jnp.abs(nrm(ks[15], (F2,)))
    s3 = g3 / jnp.sqrt(v3 + BN_EPS)

    wfc = _renorm(nrm(ks[16], (CLASSES, LINEAR), 0.5), 0.25)                # max_norm2
    bfc = nrm(ks[17], (CLASSES,))

    return dict(w1=w1, s1=s1, b1=be1 - m1 * s1,
                w2=w2, s2=s2, b2=be2 - m2 * s2,
                w3=w3, w4=w4, s3=s3, b3=be3 - m3 * s3,
                wfc=wfc, bfc=bfc)


if __name__ == "__main__":
    key = jax.random.PRNGKey(0)
    kx, kp = jax.random.split(key)
    x = jax.random.normal(kx, (BATCH, 1, CHANS, TIME), jnp.float32)
    params = init_params(kp)
    folded = fold_params(params)          # computed once; reuse across calls in a serving loop

    out = eegnet_forward(x, folded)
    out = jax.block_until_ready(out)
    assert out.shape == (BATCH, CLASSES)

    ref = eegnet_ref(x, params)
    err = float(jnp.max(jnp.abs(out - ref)))
    # tolerance loosened (vs 1e-3) because the two K>=128 matmuls use bf16 operands
    # with f32 accumulation, per the performance review.
    if not bool(jnp.allclose(out, ref, rtol=3e-2, atol=3e-2)):
        raise AssertionError(f"Pallas kernel mismatch vs reference, max abs err = {err}")
    print("KERNEL_OK")
</pallas_src>

<mosaic_0001>
module attributes {stable_mosaic.version = 11 : i64} {
  func.func @eegnet_kernel(%arg0: i32, %arg1: memref<16x256xf32, #tpu.memory_space<vmem>>, %arg2: memref<32x256xbf16, #tpu.memory_space<vmem>>, %arg3: memref<32x2xf32, #tpu.memory_space<vmem>>, %arg4: memref<32x16xf32, #tpu.memory_space<vmem>>, %arg5: memref<128x16xbf16, #tpu.memory_space<vmem>>, %arg6: memref<32x32xf32, #tpu.memory_space<vmem>>, %arg7: memref<3x32x16xf32, #tpu.memory_space<vmem>>, %arg8: memref<3x2xf32, #tpu.memory_space<vmem>>, %arg9: memref<256x128xbf16, #tpu.memory_space<vmem>>, %arg10: memref<32x384xf32, #tpu.memory_space<vmem>>) attributes {dimension_semantics = [#tpu.dimension_semantics<arbitrary>], iteration_bounds = array<i64: 1>, scalar_prefetch = 0 : i64, scratch_operands = 2 : i64, tpu.core_type = #tpu.core_type<tc>, window_params = [{pipeline_mode = #tpu.pipeline_mode<synchronous>, transform_indices = @transform_0, window_bounds = array<i64: 16, 256>}, {pipeline_mode = #tpu.pipeline_mode<synchronous>, transform_indices = @transform_1, window_bounds = array<i64: 32, 256>}, {pipeline_mode = #tpu.pipeline_mode<synchronous>, transform_indices = @transform_2, window_bounds = array<i64: 32, 2>}, {pipeline_mode = #tpu.pipeline_mode<synchronous>, transform_indices = @transform_3, window_bounds = array<i64: 32, 16>}, {pipeline_mode = #tpu.pipeline_mode<synchronous>, transform_indices = @transform_4, window_bounds = array<i64: 128, 16>}, {pipeline_mode = #tpu.pipeline_mode<synchronous>, transform_indices = @transform_5, window_bounds = array<i64: 32, 32>}, {pipeline_mode = #tpu.pipeline_mode<synchronous>, transform_indices = @transform_6, window_bounds = array<i64: 3, 32, 16>}, {pipeline_mode = #tpu.pipeline_mode<synchronous>, transform_indices = @transform_7, window_bounds = array<i64: 3, 2>}]} {
    %c0 = arith.constant 0 : index
    %c57 = arith.constant 57 : index
    %0 = vector.load %arg1[%c0, %c57] : memref<16x256xf32, #tpu.memory_space<vmem>>, vector<16x128xf32>
    %1 = arith.truncf %0 : vector<16x128xf32> to vector<16x128xbf16>
    %c0_0 = arith.constant 0 : index
    %c0_1 = arith.constant 0 : index
    %2 = vector.load %arg9[%c0_0, %c0_1] : memref<256x128xbf16, #tpu.memory_space<vmem>>, vector<16x128xbf16>
    tpu.vector_store %arg9[%c0_0, %c0_1], %1 {strides = array<i32>} : memref<256x128xbf16, #tpu.memory_space<vmem>>, vector<16x128xbf16>,
    %c0_2 = arith.constant 0 : index
    %c58 = arith.constant 58 : index
    %3 = vector.load %arg1[%c0_2, %c58] : memref<16x256xf32, #tpu.memory_space<vmem>>, vector<16x128xf32>
    %4 = arith.truncf %3 : vector<16x128xf32> to vector<16x128xbf16>
    %c16 = arith.constant 16 : index
    %c0_3 = arith.constant 0 : index
    %5 = vector.load %arg9[%c16, %c0_3] : memref<256x128xbf16, #tpu.memory_space<vmem>>, vector<16x128xbf16>
    tpu.vector_store %arg9[%c16, %c0_3], %4 {strides = array<i32>} : memref<256x128xbf16, #tpu.memory_space<vmem>>, vector<16x128xbf16>,
    %c0_4 = arith.constant 0 : index
    %c59 = arith.constant 59 : index
    %6 = vector.load %arg1[%c0_4, %c59] : memref<16x256xf32, #tpu.memory_space<vmem>>, vector<16x128xf32>
    %7 = arith.truncf %6 : vector<16x128xf32> to vector<16x128xbf16>
    %c32 = arith.constant 32 : index
    %c0_5 = arith.constant 0 : index
    %8 = vector.load %arg9[%c32, %c0_5] : memref<256x128xbf16, #tpu.memory_space<vmem>>, vector<16x128xbf16>
    tpu.vector_store %arg9[%c32, %c0_5], %7 {strides = array<i32>} : memref<256x128xbf16, #tpu.memory_space<vmem>>, vector<16x128xbf16>,
    %c0_6 = arith.constant 0 : index
    %c60 = arith.constant 60 : index
    %9 = vector.load %arg1[%c0_6, %c60] : memref<16x256xf32, #tpu.memory_space<vmem>>, vector<16x128xf32>
    %10 = arith.truncf %9 : vector<16x128xf32> to vector<16x128xbf16>
    %c48 = arith.constant 48 : index
    %c0_7 = arith.constant 0 : index
    %11 = vector.load %arg9[%c48, %c0_7] : memref<256x128xbf16, #tpu.memory_space<vmem>>, vector<16x128xbf16>
    tpu.vector_store %arg9[%c48, %c0_7], %10 {strides = array<i32>} : memref<256x128xbf16, #tpu.memory_space<vmem>>, vector<16x128xbf16>,
    %c0_8 = arith.constant 0 : index
    %c61 = arith.constant 61 : index
    %12 = vector.load %arg1[%c0_8, %c61] : memref<16x256xf32, #tpu.memory_space<vmem>>, vector<16x128xf32>
    %13 = arith.truncf %12 : vector<16x128xf32> to vector<16x128xbf16>
    %c64 = arith.constant 64 : index
    %c0_9 = arith.constant 0 : index
    %14 = vector.load %arg9[%c64, %c0_9] : memref<256x128xbf16, #tpu.memory_space<vmem>>, vector<16x128xbf16>
    tpu.vector_store %arg9[%c64, %c0_9], %13 {strides = array<i32>} : memref<256x128xbf16, #tpu.memory_space<vmem>>, vector<16x128xbf16>,
    %c0_10 = arith.constant 0 : index
    %c62 = arith.constant 62 : index
    %15 = vector.load %arg1[%c0_10, %c62] : memref<16x256xf32, #tpu.memory_space<vmem>>, vector<16x128xf32>
    %16 = arith.truncf %15 : vector<16x128xf32> to vector<16x128xbf16>
    %c80 = arith.constant 80 : index
    %c0_11 = arith.constant 0 : index
    %17 = vector.load %arg9[%c80, %c0_11] : memref<256x128xbf16, #tpu.memory_space<vmem>>, vector<16x128xbf16>
    tpu.vector_store %arg9[%c80, %c0_11], %16 {strides = array<i32>} : memref<256x128xbf16, #tpu.memory_space<vmem>>, vector<16x128xbf16>,
    %c0_12 = arith.constant 0 : index
    %c63 = arith.constant 63 : index
    %18 = vector.load %arg1[%c0_12, %c63] : memref<16x256xf32, #tpu.memory_space<vmem>>, vector<16x128xf32>
    %19 = arith.truncf %18 : vector<16x128xf32> to vector<16x128xbf16>
    %c96 = arith.constant 96 : index
    %c0_13 = arith.constant 0 : index
    %20 = vector.load %arg9[%c96, %c0_13] : memref<256x128xbf16, #tpu.memory_space<vmem>>, vector<16x128xbf16>
    tpu.vector_store %arg9[%c96, %c0_13], %19 {strides = array<i32>} : memref<256x128xbf16, #tpu.memory_space<vmem>>, vector<16x128xbf16>,
    %c0_14 = arith.constant 0 : index
    %c64_15 = arith.constant 64 : index
    %21 = vector.load %arg1[%c0_14, %c64_15] : memref<16x256xf32, #tpu.memory_space<vmem>>, vector<16x128xf32>
    %22 = arith.truncf %21 : vector<16x128xf32> to vector<16x128xbf16>
    %c112 = arith.constant 112 : index
    %c0_16 = arith.constant 0 : index
    %23 = vector.load %arg9[%c112, %c0_16] : memref<256x128xbf16, #tpu.memory_space<vmem>>, vector<16x128xbf16>
    tpu.vector_store %arg9[%c112, %c0_16], %22 {strides = array<i32>} : memref<256x128xbf16, #tpu.memory_space<vmem>>, vector<16x128xbf16>,
    %c0_17 = arith.constant 0 : index
    %c65 = arith.constant 65 : index
    %24 = vector.load %arg1[%c0_17, %c65] : memref<16x256xf32, #tpu.memory_space<vmem>>, vector<16x128xf32>
    %25 = arith.truncf %24 : vector<16x128xf32> to vector<16x128xbf16>
    %c128 = arith.constant 128 : index
    %c0_18 = arith.constant 0 : index
    %26 = vector.load %arg9[%c128, %c0_18] : memref<256x128xbf16, #tpu.memory_space<vmem>>, vector<16x128xbf16>
    tpu.vector_store %arg9[%c128, %c0_18], %25 {strides = array<i32>} : memref<256x128xbf16, #tpu.memory_space<vmem>>, vector<16x128xbf16>,
    %c0_19 = arith.constant 0 : index
    %c66 = arith.constant 66 : index
    %27 = vector.load %arg1[%c0_19, %c66] : memref<16x256xf32, #tpu.memory_space<vmem>>, vector<16x128xf32>
    %28 = arith.truncf %27 : vector<16x128xf32> to vector<16x128xbf16>
    %c144 = arith.constant 144 : index
    %c0_20 = arith.constant 0 : index
    %29 = vector.load %arg9[%c144, %c0_20] : memref<256x128xbf16, #tpu.memory_space<vmem>>, vector<16x128xbf16>
    tpu.vector_store %arg9[%c144, %c0_20], %28 {strides = array<i32>} : memref<256x128xbf16, #tpu.memory_space<vmem>>, vector<16x128xbf16>,
    %c0_21 = arith.constant 0 : index
    %c67 = arith.constant 67 : index
    %30 = vector.load %arg1[%c0_21, %c67] : memref<16x256xf32, #tpu.memory_space<vmem>>, vector<16x128xf32>
    %31 = arith.truncf %30 : vector<16x128xf32> to vector<16x128xbf16>
    %c160 = arith.constant 160 : index
    %c0_22 = arith.constant 0 : index
    %32 = vector.load %arg9[%c160, %c0_22] : memref<256x128xbf16, #tpu.memory_space<vmem>>, vector<16x128xbf16>
    tpu.vector_store %arg9[%c160, %c0_22], %31 {strides = array<i32>} : memref<256x128xbf16, #tpu.memory_space<vmem>>, vector<16x128xbf16>,
    %c0_23 = arith.constant 0 : index
    %c68 = arith.constant 68 : index
    %33 = vector.load %arg1[%c0_23, %c68] : memref<16x256xf32, #tpu.memory_space<vmem>>, vector<16x128xf32>
    %34 = arith.truncf %33 : vector<16x128xf32> to vector<16x128xbf16>
    %c176 = arith.constant 176 : index
    %c0_24 = arith.constant 0 : index
    %35 = vector.load %arg9[%c176, %c0_24] : memref<256x128xbf16, #tpu.memory_space<vmem>>, vector<16x128xbf16>
    tpu.vector_store %arg9[%c176, %c0_24], %34 {strides = array<i32>} : memref<256x128xbf16, #tpu.memory_space<vmem>>, vector<16x128xbf16>,
    %c0_25 = arith.constant 0 : index
    %c69 = arith.constant 69 : index
    %36 = vector.load %arg1[%c0_25, %c69] : memref<16x256xf32, #tpu.memory_space<vmem>>, vector<16x128xf32>
    %37 = arith.truncf %36 : vector<16x128xf32> to vector<16x128xbf16>
    %c192 = arith.constant 192 : index
    %c0_26 = arith.constant 0 : index
    %38 = vector.load %arg9[%c192, %c0_26] : memref<256x128xbf16, #tpu.memory_space<vmem>>, vector<16x128xbf16>
    tpu.vector_store %arg9[%c192, %c0_26], %37 {strides = array<i32>} : memref<256x128xbf16, #tpu.memory_space<vmem>>, vector<16x128xbf16>,
    %c0_27 = arith.constant 0 : index
    %c70 = arith.constant 70 : index
    %39 = vector.load %arg1[%c0_27, %c70] : memref<16x256xf32, #tpu.memory_space<vmem>>, vector<16x128xf32>
    %40 = arith.truncf %39 : vector<16x128xf32> to vector<16x128xbf16>
    %c208 = arith.constant 208 : index
    %c0_28 = arith.constant 0 : index
    %41 = vector.load %arg9[%c208, %c0_28] : memref<256x128xbf16, #tpu.memory_space<vmem>>, vector<16x128xbf16>
    tpu.vector_store %arg9[%c208, %c0_28], %40 {strides = array<i32>} : memref<256x128xbf16, #tpu.memory_space<vmem>>, vector<16x128xbf16>,
    %c0_29 = arith.constant 0 : index
    %c71 = arith.constant 71 : index
    %42 = vector.load %arg1[%c0_29, %c71] : memref<16x256xf32, #tpu.memory_space<vmem>>, vector<16x128xf32>
    %43 = arith.truncf %42 : vector<16x128xf32> to vector<16x128xbf16>
    %c224 = arith.constant 224 : index
    %c0_30 = arith.constant 0 : index
    %44 = vector.load %arg9[%c224, %c0_30] : memref<256x128xbf16, #tpu.memory_space<vmem>>, vector<16x128xbf16>
    tpu.vector_store %arg9[%c224, %c0_30], %43 {strides = array<i32>} : memref<256x128xbf16, #tpu.memory_space<vmem>>, vector<16x128xbf16>,
    %c0_31 = arith.constant 0 : index
    %c72 = arith.constant 72 : index
    %45 = vector.load %arg1[%c0_31, %c72] : memref<16x256xf32, #tpu.memory_space<vmem>>, vector<16x128xf32>
    %46 = arith.truncf %45 : vector<16x128xf32> to vector<16x128xbf16>
    %c240 = arith.constant 240 : index
    %c0_32 = arith.constant 0 : index
    %47 = vector.load %arg9[%c240, %c0_32] : memref<256x128xbf16, #tpu.memory_space<vmem>>, vector<16x128xbf16>
    tpu.vector_store %arg9[%c240, %c0_32], %46 {strides = array<i32>} : memref<256x128xbf16, #tpu.memory_space<vmem>>, vector<16x128xbf16>,
    %c0_33 = arith.constant 0 : index
    %c0_34 = arith.constant 0 : index
    %48 = vector.load %arg2[%c0_33, %c0_34] : memref<32x256xbf16, #tpu.memory_space<vmem>>, vector<32x256xbf16>
    %c0_35 = arith.constant 0 : index
    %c0_36 = arith.constant 0 : index
    %49 = vector.load %arg9[%c0_35, %c0_36] : memref<256x128xbf16, #tpu.memory_space<vmem>>, vector<256x128xbf16>
    %cst = arith.constant dense<0.000000e+00> : vector<32x128xf32>
    %50 = tpu.matmul %48, %49, %cst {dimension_numbers = #tpu.dot_dimension_numbers<[1], [0], [0], [1], [0, 0, 1, 1], [], []>} : vector<32x256xbf16>, vector<256x128xbf16>, vector<32x128xf32> -> vector<32x128xf32>
    %c0_37 = arith.constant 0 : index
    %c0_38 = arith.constant 0 : index
    %51 = vector.load %arg3[%c0_37, %c0_38] : memref<32x2xf32, #tpu.memory_space<vmem>>, vector<32x1xf32>
    %52 = vector.broadcast %51 : vector<32x1xf32> to vector<32x128xf32>
    %53 = arith.addf %50, %52 : vector<32x128xf32>
    %cst_39 = arith.constant 0.000000e+00 : f32
    %54 = vector.broadcast %cst_39 : f32 to vector<32x128xf32>
    %55 = arith.cmpf ogt, %53, %54 : vector<32x128xf32>
    %cst_40 = arith.constant 0.000000e+00 : f32
    %56 = vector.broadcast %cst_40 : f32 to vector<32x128xf32>
    %57 = arith.minimumf %53, %56 : vector<32x128xf32>
    %58 = math.exp %57 : vector<32x128xf32>
    %cst_41 = arith.constant 1.000000e+00 : f32
    %59 = vector.broadcast %cst_41 : f32 to vector<32x128xf32>
    %60 = arith.subf %58, %59 : vector<32x128xf32>
    %61 = arith.select %55, %53, %60 : vector<32x128xi1>, vector<32x128xf32>
    %cst_42 = arith.constant 0.000000e+00 : f32
    %62 = vector.broadcast %cst_42 : f32 to vector<32x384xf32>
    %c0_43 = arith.constant 0 : index
    %c0_44 = arith.constant 0 : index
    %63 = vector.load %arg10[%c0_43, %c0_44] : memref<32x384xf32, #tpu.memory_space<vmem>>, vector<32x384xf32>
    tpu.vector_store %arg10[%c0_43, %c0_44], %62 {strides = array<i32>} : memref<32x384xf32, #tpu.memory_space<vmem>>, vector<32x384xf32>,
    %c0_45 = arith.constant 0 : index
    %c128_46 = arith.constant 128 : index
    %64 = vector.load %arg10[%c0_45, %c128_46] : memref<32x384xf32, #tpu.memory_space<vmem>>, vector<32x128xf32>
    tpu.vector_store %arg10[%c0_45, %c128_46], %61 {strides = array<i32>} : memref<32x384xf32, #tpu.memory_space<vmem>>, vector<32x128xf32>,
    %c0_47 = arith.constant 0 : index
    %c0_48 = arith.constant 0 : index
    %65 = vector.load %arg4[%c0_47, %c0_48] : memref<32x16xf32, #tpu.memory_space<vmem>>, vector<32x16xf32>
    %cst_49 = arith.constant 0.000000e+00 : f32
    %66 = vector.broadcast %cst_49 : f32 to vector<32x128xf32>
    %67 = vector.extract_strided_slice %65 {offsets = [0, 0], sizes = [32, 1], strides = [1, 1]} : vector<32x16xf32> to vector<32x1xf32>
    %c0_50 = arith.constant 0 : index
    %c72_51 = arith.constant 72 : index
    %68 = vector.load %arg10[%c0_50, %c72_51] : memref<32x384xf32, #tpu.memory_space<vmem>>, vector<32x128xf32>
    %69 = vector.broadcast %67 : vector<32x1xf32> to vector<32x128xf32>
    %70 = arith.mulf %69, %68 : vector<32x128xf32>
    %71 = arith.addf %66, %70 : vector<32x128xf32>
    %72 = vector.extract_strided_slice %65 {offsets = [0, 1], sizes = [32, 1], strides = [1, 1]} : vector<32x16xf32> to vector<32x1xf32>
    %c0_52 = arith.constant 0 : index
    %c80_53 = arith.constant 80 : index
    %73 = vector.load %arg10[%c0_52, %c80_53] : memref<32x384xf32, #tpu.memory_space<vmem>>, vector<32x128xf32>
    %74 = vector.broadcast %72 : vector<32x1xf32> to vector<32x128xf32>
    %75 = arith.mulf %74, %73 : vector<32x128xf32>
    %76 = arith.addf %71, %75 : vector<32x128xf32>
    %77 = vector.extract_strided_slice %65 {offsets = [0, 2], sizes = [32, 1], strides = [1, 1]} : vector<32x16xf32> to vector<32x1xf32>
    %c0_54 = arith.constant 0 : index
    %c88 = arith.constant 88 : index
    %78 = vector.load %arg10[%c0_54, %c88] : memref<32x384xf32, #tpu.memory_space<vmem>>, vector<32x128xf32>
    %79 = vector.broadcast %77 : vector<32x1xf32> to vector<32x128xf32>
    %80 = arith.mulf %79, %78 : vector<32x128xf32>
    %81 = arith.addf %76, %80 : vector<32x128xf32>
    %82 = vector.extract_strided_slice %65 {offsets = [0, 3], sizes = [32, 1], strides = [1, 1]} : vector<32x16xf32> to vector<32x1xf32>
    %c0_55 = arith.constant 0 : index
    %c96_56 = arith.constant 96 : index
    %83 = vector.load %arg10[%c0_55, %c96_56] : memref<32x384xf32, #tpu.memory_space<vmem>>, vector<32x128xf32>
    %84 = vector.broadcast %82 : vector<32x1xf32> to vector<32x128xf32>
    %85 = arith.mulf %84, %83 : vector<32x128xf32>
    %86 = arith.addf %81, %85 : vector<32x128xf32>
    %87 = vector.extract_strided_slice %65 {offsets = [0, 4], sizes = [32, 1], strides = [1, 1]} : vector<32x16xf32> to vector<32x1xf32>
    %c0_57 = arith.constant 0 : index
    %c104 = arith.constant 104 : index
    %88 = vector.load %arg10[%c0_57, %c104] : memref<32x384xf32, #tpu.memory_space<vmem>>, vector<32x128xf32>
    %89 = vector.broadcast %87 : vector<32x1xf32> to vector<32x128xf32>
    %90 = arith.mulf %89, %88 : vector<32x128xf32>
    %91 = arith.addf %86, %90 : vector<32x128xf32>
    %92 = vector.extract_strided_slice %65 {offsets = [0, 5], sizes = [32, 1], strides = [1, 1]} : vector<32x16xf32> to vector<32x1xf32>
    %c0_58 = arith.constant 0 : index
    %c112_59 = arith.constant 112 : index
    %93 = vector.load %arg10[%c0_58, %c112_59] : memref<32x384xf32, #tpu.memory_space<vmem>>, vector<32x128xf32>
    %94 = vector.broadcast %92 : vector<32x1xf32> to vector<32x128xf32>
    %95 = arith.mulf %94, %93 : vector<32x128xf32>
    %96 = arith.addf %91, %95 : vector<32x128xf32>
    %97 = vector.extract_strided_slice %65 {offsets = [0, 6], sizes = [32, 1], strides = [1, 1]} : vector<32x16xf32> to vector<32x1xf32>
    %c0_60 = arith.constant 0 : index
    %c120 = arith.constant 120 : index
    %98 = vector.load %arg10[%c0_60, %c120] : memref<32x384xf32, #tpu.memory_space<vmem>>, vector<32x128xf32>
    %99 = vector.broadcast %97 : vector<32x1xf32> to vector<32x128xf32>
    %100 = arith.mulf %99, %98 : vector<32x128xf32>
    %101 = arith.addf %96, %100 : vector<32x128xf32>
    %102 = vector.extract_strided_slice %65 {offsets = [0, 7], sizes = [32, 1], strides = [1, 1]} : vector<32x16xf32> to vector<32x1xf32>
    %c0_61 = arith.constant 0 : index
    %c128_62 = arith.constant 128 : index
    %103 = vector.load %arg10[%c0_61, %c128_62] : memref<32x384xf32, #tpu.memory_space<vmem>>, vector<32x128xf32>
    %104 = vector.broadcast %102 : vector<32x1xf32> to vector<32x128xf32>
    %105 = arith.mulf %104, %103 : vector<32x128xf32>
    %106 = arith.addf %101, %105 : vector<32x128xf32>
    %107 = vector.extract_strided_slice %65 {offsets = [0, 8], sizes = [32, 1], strides = [1, 1]} : vector<32x16xf32> to vector<32x1xf32>
    %c0_63 = arith.constant 0 : index
    %c136 = arith.constant 136 : index
    %108 = vector.load %arg10[%c0_63, %c136] : memref<32x384xf32, #tpu.memory_space<vmem>>, vector<32x128xf32>
    %109 = vector.broadcast %107 : vector<32x1xf32> to vector<32x128xf32>
    %110 = arith.mulf %109, %108 : vector<32x128xf32>
    %111 = arith.addf %106, %110 : vector<32x128xf32>
    %112 = vector.extract_strided_slice %65 {offsets = [0, 9], sizes = [32, 1], strides = [1, 1]} : vector<32x16xf32> to vector<32x1xf32>
    %c0_64 = arith.constant 0 : index
    %c144_65 = arith.constant 144 : index
    %113 = vector.load %arg10[%c0_64, %c144_65] : memref<32x384xf32, #tpu.memory_space<vmem>>, vector<32x128xf32>
    %114 = vector.broadcast %112 : vector<32x1xf32> to vector<32x128xf32>
    %115 = arith.mulf %114, %113 : vector<32x128xf32>
    %116 = arith.addf %111, %115 : vector<32x128xf32>
    %117 = vector.extract_strided_slice %65 {offsets = [0, 10], sizes = [32, 1], strides = [1, 1]} : vector<32x16xf32> to vector<32x1xf32>
    %c0_66 = arith.constant 0 : index
    %c152 = arith.constant 152 : index
    %118 = vector.load %arg10[%c0_66, %c152] : memref<32x384xf32, #tpu.memory_space<vmem>>, vector<32x128xf32>
    %119 = vector.broadcast %117 : vector<32x1xf32> to vector<32x128xf32>
    %120 = arith.mulf %119, %118 : vector<32x128xf32>
    %121 = arith.addf %116, %120 : vector<32x128xf32>
    %122 = vector.extract_strided_slice %65 {offsets = [0, 11], sizes = [32, 1], strides = [1, 1]} : vector<32x16xf32> to vector<32x1xf32>
    %c0_67 = arith.constant 0 : index
    %c160_68 = arith.constant 160 : index
    %123 = vector.load %arg10[%c0_67, %c160_68] : memref<32x384xf32, #tpu.memory_space<vmem>>, vector<32x128xf32>
    %124 = vector.broadcast %122 : vector<32x1xf32> to vector<32x128xf32>
    %125 = arith.mulf %124, %123 : vector<32x128xf32>
    %126 = arith.addf %121, %125 : vector<32x128xf32>
    %127 = vector.extract_strided_slice %65 {offsets = [0, 12], sizes = [32, 1], strides = [1, 1]} : vector<32x16xf32> to vector<32x1xf32>
    %c0_69 = arith.constant 0 : index
    %c168 = arith.constant 168 : index
    %128 = vector.load %arg10[%c0_69, %c168] : memref<32x384xf32, #tpu.memory_space<vmem>>, vector<32x128xf32>
    %129 = vector.broadcast %127 : vector<32x1xf32> to vector<32x128xf32>
    %130 = arith.mulf %129, %128 : vector<32x128xf32>
    %131 = arith.addf %126, %130 : vector<32x128xf32>
    %132 = vector.extract_strided_slice %65 {offsets = [0, 13], sizes = [32, 1], strides = [1, 1]} : vector<32x16xf32> to vector<32x1xf32>
    %c0_70 = arith.constant 0 : index
    %c176_71 = arith.constant 176 : index
    %133 = vector.load %arg10[%c0_70, %c176_71] : memref<32x384xf32, #tpu.memory_space<vmem>>, vector<32x128xf32>
    %134 = vector.broadcast %132 : vector<32x1xf32> to vector<32x128xf32>
    %135 = arith.mulf %134, %133 : vector<32x128xf32>
    %136 = arith.addf %131, %135 : vector<32x128xf32>
    %137 = vector.extract_strided_slice %65 {offsets = [0, 14], sizes = [32, 1], strides = [1, 1]} : vector<32x16xf32> to vector<32x1xf32>
    %c0_72 = arith.constant 0 : index
    %c184 = arith.constant 184 : index
    %138 = vector.load %arg10[%c0_72, %c184] : memref<32x384xf32, #tpu.memory_space<vmem>>, vector<32x128xf32>
    %139 = vector.broadcast %137 : vector<32x1xf32> to vector<32x128xf32>
    %140 = arith.mulf %139, %138 : vector<32x128xf32>
    %141 = arith.addf %136, %140 : vector<32x128xf32>
    %142 = vector.extract_strided_slice %65 {offsets = [0, 15], sizes = [32, 1], strides = [1, 1]} : vector<32x16xf32> to vector<32x1xf32>
    %c0_73 = arith.constant 0 : index
    %c192_74 = arith.constant 192 : index
    %143 = vector.load %arg10[%c0_73, %c192_74] : memref<32x384xf32, #tpu.memory_space<vmem>>, vector<32x128xf32>
    %144 = vector.broadcast %142 : vector<32x1xf32> to vector<32x128xf32>
    %145 = arith.mulf %144, %143 : vector<32x128xf32>
    %146 = arith.addf %141, %145 : vector<32x128xf32>
    %147 = arith.truncf %146 : vector<32x128xf32> to vector<32x128xbf16>
    %c0_75 = arith.constant 0 : index
    %c0_76 = arith.constant 0 : index
    %148 = vector.load %arg5[%c0_75, %c0_76] : memref<128x16xbf16, #tpu.memory_space<vmem>>, vector<128x16xbf16>
    %cst_77 = arith.constant dense<0.000000e+00> : vector<32x16xf32>
    %149 = tpu.matmul %147, %148, %cst_77 {dimension_numbers = #tpu.dot_dimension_numbers<[1], [0], [0], [1], [0, 0, 1, 1], [], []>} : vector<32x128xbf16>, vector<128x16xbf16>, vector<32x16xf32> -> vector<32x16xf32>
    %c0_78 = arith.constant 0 : index
    %c0_79 = arith.constant 0 : index
    %150 = vector.load %arg6[%c0_78, %c0_79] : memref<32x32xf32, #tpu.memory_space<vmem>>, vector<32x32xf32>
    %cst_80 = arith.constant dense<0.000000e+00> : vector<32x16xf32>
    %151 = tpu.matmul %150, %149, %cst_80 {dimension_numbers = #tpu.dot_dimension_numbers<[1], [0], [0], [1], [0, 0, 1, 1], [], []>} : vector<32x32xf32>, vector<32x16xf32>, vector<32x16xf32> -> vector<32x16xf32>
    %c0_81 = arith.constant 0 : index
    %c1 = arith.constant 1 : index
    %152 = vector.load %arg3[%c0_81, %c1] : memref<32x2xf32, #tpu.memory_space<vmem>>, vector<32x1xf32>
    %153 = vector.broadcast %152 : vector<32x1xf32> to vector<32x16xf32>
    %154 = arith.addf %151, %153 : vector<32x16xf32>
    %cst_82 = arith.constant 0.000000e+00 : f32
    %155 = vector.broadcast %cst_82 : f32 to vector<32x16xf32>
    %156 = arith.cmpf ogt, %154, %155 : vector<32x16xf32>
    %cst_83 = arith.constant 0.000000e+00 : f32
    %157 = vector.broadcast %cst_83 : f32 to vector<32x16xf32>
    %158 = arith.minimumf %154, %157 : vector<32x16xf32>
    %159 = math.exp %158 : vector<32x16xf32>
    %cst_84 = arith.constant 1.000000e+00 : f32
    %160 = vector.broadcast %cst_84 : f32 to vector<32x16xf32>
    %161 = arith.subf %159, %160 : vector<32x16xf32>
    %162 = arith.select %156, %154, %161 : vector<32x16xi1>, vector<32x16xf32>
    %c0_85 = arith.constant 0 : index
    %c0_86 = arith.constant 0 : index
    %c0_87 = arith.constant 0 : index
    %163 = vector.load %arg7[%c0_85, %c0_86, %c0_87] : memref<3x32x16xf32, #tpu.memory_space<vmem>>, vector<3x32x16xf32>
    %164 = vector.shape_cast %162 : vector<32x16xf32> to vector<1x32x16xf32>
    %165 = vector.broadcast %164 : vector<1x32x16xf32> to vector<3x32x16xf32>
    %166 = arith.mulf %163, %165 : vector<3x32x16xf32>
    %cst_88 = arith.constant dense<0.000000e+00> : vector<3x32xf32>
    %167 = vector.multi_reduction <add>, %166, %cst_88 [2] : vector<3x32x16xf32> to vector<3x32xf32>
    %168 = vector.extract_strided_slice %167 {offsets = [0, 0], sizes = [3, 16], strides = [1, 1]} : vector<3x32xf32> to vector<3x16xf32>
    %cst_89 = arith.constant dense<0.000000e+00> : vector<3xf32>
    %169 = vector.multi_reduction <add>, %168, %cst_89 [1] : vector<3x16xf32> to vector<3xf32>
    %170 = vector.shape_cast %169 : vector<3xf32> to vector<3x1xf32>
    %171 = vector.extract_strided_slice %167 {offsets = [0, 16], sizes = [3, 16], strides = [1, 1]} : vector<3x32xf32> to vector<3x16xf32>
    %cst_90 = arith.constant dense<0.000000e+00> : vector<3xf32>
    %172 = vector.multi_reduction <add>, %171, %cst_90 [1] : vector<3x16xf32> to vector<3xf32>
    %173 = vector.shape_cast %172 : vector<3xf32> to vector<3x1xf32>
    %174 = tpu.concatenate %170, %173 in 1 : vector<3x1xf32>, vector<3x1xf32> -> vector<3x2xf32>
    %c0_91 = arith.constant 0 : index
    %c0_92 = arith.constant 0 : index
    %175 = vector.load %arg8[%c0_91, %c0_92] : memref<3x2xf32, #tpu.memory_space<vmem>>, vector<3x2xf32>
    tpu.vector_store %arg8[%c0_91, %c0_92], %174 {strides = array<i32>} : memref<3x2xf32, #tpu.memory_space<vmem>>, vector<3x2xf32>,
    return
  }
  func.func @transform_0(%arg0: i32) -> (i32, i32) {
    %c0_i32 = arith.constant 0 : i32
    %c0_i32_0 = arith.constant 0 : i32
    %c0_i32_1 = arith.constant 0 : i32
    return %c0_i32, %c0_i32_0 : i32, i32
  }
  func.func @transform_1(%arg0: i32) -> (i32, i32) {
    %c0_i32 = arith.constant 0 : i32
    %c0_i32_0 = arith.constant 0 : i32
    %c0_i32_1 = arith.constant 0 : i32
    return %c0_i32, %c0_i32_0 : i32, i32
  }
  func.func @transform_2(%arg0: i32) -> (i32, i32) {
    %c0_i32 = arith.constant 0 : i32
    %c0_i32_0 = arith.constant 0 : i32
    %c0_i32_1 = arith.constant 0 : i32
    return %c0_i32, %c0_i32_0 : i32, i32
  }
  func.func @transform_3(%arg0: i32) -> (i32, i32) {
    %c0_i32 = arith.constant 0 : i32
    %c0_i32_0 = arith.constant 0 : i32
    %c0_i32_1 = arith.constant 0 : i32
    return %c0_i32, %c0_i32_0 : i32, i32
  }
  func.func @transform_4(%arg0: i32) -> (i32, i32) {
    %c0_i32 = arith.constant 0 : i32
    %c0_i32_0 = arith.constant 0 : i32
    %c0_i32_1 = arith.constant 0 : i32
    return %c0_i32, %c0_i32_0 : i32, i32
  }
  func.func @transform_5(%arg0: i32) -> (i32, i32) {
    %c0_i32 = arith.constant 0 : i32
    %c0_i32_0 = arith.constant 0 : i32
    %c0_i32_1 = arith.constant 0 : i32
    return %c0_i32, %c0_i32_0 : i32, i32
  }
  func.func @transform_6(%arg0: i32) -> (i32, i32, i32) {
    %c0_i32 = arith.constant 0 : i32
    %c0_i32_0 = arith.constant 0 : i32
    %c0_i32_1 = arith.constant 0 : i32
    %c0_i32_2 = arith.constant 0 : i32
    return %c0_i32, %c0_i32_0, %c0_i32_1 : i32, i32, i32
  }
  func.func @transform_7(%arg0: i32) -> (i32, i32) {
    %c0_i32 = arith.constant 0 : i32
    %c0_i32_0 = arith.constant 0 : i32
    %c0_i32_1 = arith.constant 0 : i32
    return %c0_i32, %c0_i32_0 : i32, i32
  }
}

</mosaic_0001>

<bundles_post_ra>
// kernel: tpu_custom_call.1
= control target key start
LH: loop header
LB: loop body
LE: loop exit
PB: predicated region body
PF: predicated region fallthrough
CT: control target
= control target key end

     0   :  { %s2268_s28 = smov 69   ;;  %s2269_s29 = smov 70   ;;  %v2277_v6 = vmov 0   ;;  %vm82_vm0 = vcmask 564224   ;;  %v3365_v21 = vmov 1   ;;  %vm124_vm1 = vcmask 547840   ;;  %s3354_s0 = inlined_call_operand.vmem [shape: f32[16,256], index: 0, kind: input, shape index: {}]   ;;  %s3355_s2 = inlined_call_operand.vmem [shape: f32[32,2], index: 2, kind: input, shape index: {}]   ;;  %s3356_s3 = inlined_call_operand.vmem [shape: f32[32,16], index: 3, kind: input, shape index: {}]   ;;  %s3357_s1 = inlined_call_operand.vmem [shape: bf16[32,256], index: 1, kind: input, shape index: {}]   ;;  %s3358_s4 = inlined_call_operand.vmem [shape: bf16[128,16], index: 4, kind: input, shape index: {}]   ;;  %s3359_s5 = inlined_call_operand.vmem [shape: f32[32,32], index: 5, kind: input, shape index: {}]   ;;  %s3360_s6 = inlined_call_operand.vmem [shape: f32[3,32,16], index: 6, kind: input, shape index: {}]   ;;  %s3361_s7 = inlined_call_operand.vmem [shape: f32[3,2], index: 7, kind: output, shape index: {}]  }
   0x1   :  { %v68_v0 = vld [vmem:[%s3354_s0] sm:$0xff]  ;;  %v69_v1 = vld [vmem:[%s3354_s0 + $0x8] sm:$0xff]  ;;  %s2270_s30 = smov 71   ;;  %v70_v3 = vld [vmem:[%s3354_s0 + $0x10] sm:$0xff]  ;;  %s2271_s12 = smov 67   ;;  %2192 = vset.pattern.permute.xlu2 %v2277_v6  ;;  %2194 = vset.pattern.permute.xlu1 %v2277_v6  ;;  %vm145_vm2 = vcmask 539648  }
   0x2   :  { %v72_v2 = vpack.c.bf16 %v69_v1, %v68_v0  ;;  %v71_v4 = vld [vmem:[%s3354_s0 + $0x18] sm:$0xff]  ;;  %s2272_s13 = smov 68   ;;  %s2273_s14 = smov 66   ;;  %2193 = vset.pattern.permute.xlu0 %v2277_v6  ;;  %v398_v7 = vld [vmem:[%s3355_s2] sm:$0xff]  ;;  %v400_v9 = vld [vmem:[%s3355_s2 + $0x10] sm:$0xff]  ;;  %vm61_vm3 = vcmask 572416  }
   0x3   :  { %v73_v5 = vpack.c.bf16 %v71_v4, %v70_v3  ;;  %s2274_s15 = smov 64   ;;  %s2275_s16 = smov 65   ;;  %v401_v8 = vld [vmem:[%s3355_s2 + $0x18] sm:$0xff]  ;;  %v399_v10 = vld [vmem:[%s3355_s2 + $0x8] sm:$0xff]  ;;  %v2389_v15 = vld [vmem:[%s3356_s3] sm:$0xff]  ;;  %vm40_vm4 = vcmask 580608  }
   0x4   :  { %76 = vrot.lane.b32.xlu2 %v72_v2, %s2268_s28  ;;  %55 = vrot.lane.b32.xlu1 %v72_v2, %s2269_s29  ;;  %s2276_s0 = smov 63   ;;  %s2278_s17 = smov 61   ;;  %v2384_v14 = vld [vmem:[%s3356_s3 + $0x8] sm:$0xff]  ;;  %v2394_v16 = vld [vmem:[%s3356_s3 + $0x10] sm:$0xff]  ;;  %vm187_vm5 = vcmask 523264   ;;  %vm208_vm6 = vcmask 515072  }
   0x5   :  { %34 = vrot.lane.b32.xlu0 %v72_v2, %s2270_s30  ;;  %s2279_s18 = smov 62   ;;  %s2280_s19 = smov 60   ;;  %v2402_v20 = vld [vmem:[%s3356_s3 + $0x18] sm:$0xff]  ;;  %vm103_vm7 = vcmask 556032   ;;  %vm250_vm8 = vcmask 498688   ;;  %vm271_vm9 = vcmask 490496  }
   0x6   :  { %s2281_s20 = smov 58   ;;  %s2282_s21 = smov 59   ;;  %vm166_vm10 = vcmask 531456   ;;  %vm313_vm11 = vcmask 474112   ;;  %vm334_vm12 = vcmask 465920   ;;  %vm229_vm13 = vcmask 506880  }
   0x7   :  { %s2283_s22 = smov 57   ;;  %s2284_s25 = smov 56   ;;  %vm292_vm14 = vcmask 482304   ;;  %vm355_vm15 = vcmask 457728  }
   0x8   :  { %s2310_s23 = smov 24   ;;  %s2311_s24 = smov 16  }
   0x9   :  { %s2312_s26 = smov 8  }
   0xc   :  { %78 = vrot.lane.b32.xlu2 %v73_v5, %s2268_s28  ;;  %57 = vrot.lane.b32.xlu1 %v73_v5, %s2269_s29 }
   0xd   :  { %36 = vrot.lane.b32.xlu0 %v73_v5, %s2270_s30 }
  0x14   :  { %118 = vrot.lane.b32.xlu2 %v72_v2, %s2271_s12  ;;  %99 = vrot.lane.b32.xlu1 %v73_v5, %s2272_s13 }
  0x15   :  { %97 = vrot.lane.b32.xlu0 %v72_v2, %s2272_s13  ;;  %s2293_s13 = smov 96  }
  0x1c   :  { %141 = vrot.lane.b32.xlu2 %v73_v5, %s2273_s14  ;;  %139 = vrot.lane.b32.xlu1 %v72_v2, %s2273_s14  ;;  %s2295_s14 = smov 88  }
  0x1d   :  { %120 = vrot.lane.b32.xlu0 %v73_v5, %s2271_s12  ;;  %s2291_s12 = smov 104  }
  0x24   :  { %181 = vrot.lane.b32.xlu2 %v72_v2, %s2274_s15  ;;  %162 = vrot.lane.b32.xlu1 %v73_v5, %s2275_s16 }
  0x25   :  { %160 = vrot.lane.b32.xlu0 %v72_v2, %s2275_s16  ;;  %s2305_s16 = smov 80  }
  0x2c   :  { %204 = vrot.lane.b32.xlu2 %v73_v5, %s2276_s0  ;;  %202 = vrot.lane.b32.xlu1 %v72_v2, %s2276_s0  ;;  %s2306_s0 = smov 72  }
  0x2d   :  { %183 = vrot.lane.b32.xlu0 %v73_v5, %s2274_s15 }
  0x34   :  { %244 = vrot.lane.b32.xlu2 %v72_v2, %s2278_s17  ;;  %225 = vrot.lane.b32.xlu1 %v73_v5, %s2279_s18 }
  0x35   :  { %223 = vrot.lane.b32.xlu0 %v72_v2, %s2279_s18 }
  0x3c   :  { %267 = vrot.lane.b32.xlu2 %v73_v5, %s2280_s19  ;;  %265 = vrot.lane.b32.xlu1 %v72_v2, %s2280_s19 }
  0x3d   :  { %246 = vrot.lane.b32.xlu0 %v73_v5, %s2278_s17  ;;  %s2307_s17 = smov 48  }
  0x44   :  { %307 = vrot.lane.b32.xlu2 %v72_v2, %s2281_s20  ;;  %288 = vrot.lane.b32.xlu1 %v73_v5, %s2282_s21 }
  0x45   :  { %286 = vrot.lane.b32.xlu0 %v72_v2, %s2282_s21  ;;  %s2287_s21 = smov 120  }
  0x4c   :  { %330 = vrot.lane.b32.xlu2 %v73_v5, %s2283_s22  ;;  %328 = vrot.lane.b32.xlu1 %v72_v2, %s2283_s22 }
  0x4d   :  { %309 = vrot.lane.b32.xlu0 %v73_v5, %s2281_s20  ;;  %s2308_s20 = smov 40  }
  0x54   :  { %404 = vperm.xlu2 %2192, %v398_v7   ;;  %351 = vrot.lane.b32.xlu1 %v73_v5, %s2284_s25 }
  0x55   :  { %349 = vrot.lane.b32.xlu0 %v72_v2, %s2284_s25 }
  0x5c   :  { %419 = vperm.xlu2 %2192, %v401_v8   ;;  %414 = vperm.xlu1 %2194, %v400_v9  }
  0x5d   :  { %409 = vperm.xlu0 %2193, %v399_v10  }
  0x5e   :  { %v77_v11 = vpop.permute.xlu2 %76 }
  0x5f   :  { %v80_v12 = vrot.slane %v77_v11, 4 }
  0x61   :  { %v83_v13 = vsel %vm82_vm0, %v77_v11, %v80_v12 }
  0x62   :  { %87 = vst [vmem:[#allocation2 + $0x10] sm:$0xf] %v83_v13 }
  0x64   :  { %635 = vperm.xlu2 %2192, %v2384_v14   ;;  %630 = vperm.xlu1 %2194, %v2389_v15  }
  0x65   :  { %640 = vperm.xlu0 %2193, %v2394_v16  }
  0x66   :  { %v79_v17 = vpop.permute.xlu2 %78 }
  0x67   :  { %v81_v18 = vrot.slane %v79_v17, 4 }
  0x69   :  { %v84_v19 = vsel %vm82_vm0, %v79_v17, %v81_v18 }
  0x6a   :  { %88 = vst [vmem:[#allocation2 + $0x14] sm:$0xf] %v84_v19 }
  0x6c   :  { %2195 = vset.pattern.permute.xlu2 %v3365_v21  ;;  %645 = vperm.xlu1 %2194, %v2402_v20  }
  0x6d   :  { %2196 = vset.pattern.permute.xlu0 %v3365_v21  ;;  %665 = vperm.xlu2 %2195, %v2389_v15  }
  0x6e   :  { %669 = vperm.xlu0 %2196, %v2384_v14   ;;  %v119_v22 = vpop.permute.xlu2 %118 }
  0x6f   :  { %v122_v23 = vrot.slane %v119_v22, 4 }
  0x71   :  { %v125_v24 = vsel %vm124_vm1, %v119_v22, %v122_v23 }
  0x72   :  { %129 = vst [vmem:[#allocation2 + $0x20] sm:$0xf] %v125_v24 }
  0x74   :  { %2197 = vset.pattern.permute.xlu1 %v3365_v21 }
  0x75   :  { %677 = vperm.xlu2 %2195, %v2402_v20   ;;  %673 = vperm.xlu1 %2197, %v2394_v16  }
  0x76   :  { %v142_v25 = vpop.permute.xlu2 %141  ;;  %v56_v26 = vpop.permute.xlu1 %55 }
  0x77   :  { %v144_v27 = vrot.slane %v142_v25, 4  ;;  %v59_v28 = vrot.slane %v56_v26, 4  ;;  %v35_v29 = vpop.permute.xlu0 %34 }
  0x78   :  { %v38_v30 = vrot.slane %v35_v29, 4 }
  0x79   :  { %v147_v31 = vsel %vm145_vm2, %v142_v25, %v144_v27  ;;  %v62_v32 = vsel %vm61_vm3, %v56_v26, %v59_v28 }
  0x7a   :  { %151 = vst [vmem:[#allocation2 + $0x2c] sm:$0xf] %v147_v31  ;;  %v41_v33 = vsel %vm40_vm4, %v35_v29, %v38_v30 }
  0x7b   :  { %66 = vst [vmem:[#allocation2 + $0x8] sm:$0xf] %v62_v32 }
  0x7c   :  { %45 = vst [vmem:[#allocation2] sm:$0xf] %v41_v33 }
  0x7e   :  { %v182_v34 = vpop.permute.xlu2 %181  ;;  %v58_v35 = vpop.permute.xlu1 %57 }
  0x7f   :  { %v185_v36 = vrot.slane %v182_v34, 4  ;;  %v60_v37 = vrot.slane %v58_v35, 4  ;;  %v37_v38 = vpop.permute.xlu0 %36 }
  0x80   :  { %v39_v39 = vrot.slane %v37_v38, 4 }
  0x81   :  { %v188_v40 = vsel %vm187_vm5, %v182_v34, %v185_v36  ;;  %v63_v41 = vsel %vm61_vm3, %v58_v35, %v60_v37 }
  0x82   :  { %192 = vst [vmem:[#allocation2 + $0x38] sm:$0xf] %v188_v40  ;;  %v42_v42 = vsel %vm40_vm4, %v37_v38, %v39_v39  ;;  %vm712_vm4 = vcmask 982016  }
  0x83   :  { %67 = vst [vmem:[#allocation2 + $0xc] sm:$0xf] %v63_v41 }
  0x84   :  { %46 = vst [vmem:[#allocation2 + $0x4] sm:$0xf] %v42_v42 }
  0x86   :  { %v205_v43 = vpop.permute.xlu2 %204  ;;  %v100_v44 = vpop.permute.xlu1 %99 }
  0x87   :  { %v207_v45 = vrot.slane %v205_v43, 4  ;;  %v102_v46 = vrot.slane %v100_v44, 4  ;;  %v98_v47 = vpop.permute.xlu0 %97 }
  0x88   :  { %v101_v48 = vrot.slane %v98_v47, 4 }
  0x89   :  { %v210_v49 = vsel %vm208_vm6, %v205_v43, %v207_v45  ;;  %v105_v50 = vsel %vm103_vm7, %v100_v44, %v102_v46  ;;  %v2286_v46 = vmov 2  }
  0x8a   :  { %214 = vst [vmem:[#allocation2 + $0x44] sm:$0xf] %v210_v49  ;;  %v104_v51 = vsel %vm103_vm7, %v98_v47, %v101_v48  ;;  %2199 = vset.pattern.permute.xlu1 %v2286_v46  ;;  %2198 = vset.pattern.permute.xlu0 %v2286_v46  ;;  %vm850_vm7 = vcmask 850944  }
  0x8b   :  { %109 = vst [vmem:[#allocation2 + $0x1c] sm:$0xf] %v105_v50  ;;  %2200 = vset.pattern.permute.xlu2 %v2286_v46 }
  0x8c   :  { %108 = vst [vmem:[#allocation2 + $0x18] sm:$0xf] %v104_v51 }
  0x8e   :  { %v245_v52 = vpop.permute.xlu2 %244  ;;  %v140_v53 = vpop.permute.xlu1 %139 }
  0x8f   :  { %v248_v54 = vrot.slane %v245_v52, 4  ;;  %v143_v55 = vrot.slane %v140_v53, 4  ;;  %v121_v56 = vpop.permute.xlu0 %120 }
  0x90   :  { %v123_v57 = vrot.slane %v121_v56, 4 }
  0x91   :  { %v251_v58 = vsel %vm250_vm8, %v245_v52, %v248_v54  ;;  %v146_v59 = vsel %vm145_vm2, %v140_v53, %v143_v55  ;;  %v2125_v53 = vld [vmem:[#allocation2 + $0x10] sm:$0xff] }
  0x92   :  { %255 = vst [vmem:[#allocation2 + $0x50] sm:$0xf] %v251_v58  ;;  %v126_v60 = vsel %vm124_vm1, %v121_v56, %v123_v57  ;;  %v2124_v57 = vld [vmem:[#allocation2 + $0x8] sm:$0xff]  ;;  %v1997_v58 = vld [vmem:[%s3357_s1] sm:$0xf] }
  0x93   :  { %150 = vst [vmem:[#allocation2 + $0x28] sm:$0xf] %v146_v59  ;;  %v2126_v48 = vld [vmem:[#allocation2 + $0x18] sm:$0xff]  ;;  %v2120_v59 = vld [vmem:[%s3357_s1 + $0x4] sm:$0xf0] }
  0x94   :  { %130 = vst [vmem:[#allocation2 + $0x24] sm:$0xf] %v126_v60 }
  0x96   :  { %v268_v61 = vpop.permute.xlu2 %267  ;;  %v163_v62 = vpop.permute.xlu1 %162 }
  0x97   :  { %v270_v63 = vrot.slane %v268_v61, 4  ;;  %v165_v0 = vrot.slane %v163_v62, 4  ;;  %v161_v1 = vpop.permute.xlu0 %160 }
  0x98   :  { %v164_v2 = vrot.slane %v161_v1, 4 }
  0x99   :  { %v273_v3 = vsel %vm271_vm9, %v268_v61, %v270_v63  ;;  %v168_v4 = vsel %vm166_vm10, %v163_v62, %v165_v0  ;;  %v2123_v0 = vld [vmem:[#allocation2] sm:$0xff] }
  0x9a   :  { %277 = vst [vmem:[#allocation2 + $0x5c] sm:$0xf] %v273_v3  ;;  %v167_v5 = vsel %vm166_vm10, %v161_v1, %v164_v2  ;;  %v2128_v38 = vld [vmem:[#allocation2 + $0x28] sm:$0xff]  ;;  %v1998_v3 = vor.u32 %v2120_v59, %v1997_v58  ;;  %vm1057_vm10 = vcmask 654336  }
  0x9b   :  { %172 = vst [vmem:[#allocation2 + $0x34] sm:$0xf] %v168_v4  ;;  %v2127_v43 = vld [vmem:[#allocation2 + $0x20] sm:$0xff] }
  0x9c   :  { %171 = vst [vmem:[#allocation2 + $0x30] sm:$0xf] %v167_v5 }
  0x9e   :  { %v308_v6 = vpop.permute.xlu2 %307  ;;  %v203_v7 = vpop.permute.xlu1 %202 }
  0x9f   :  { %v311_v8 = vrot.slane %v308_v6, 4  ;;  %v206_v9 = vrot.slane %v203_v7, 4  ;;  %v184_v10 = vpop.permute.xlu0 %183 }
  0xa0   :  { %v186_v11 = vrot.slane %v184_v10, 4 }
  0xa1   :  { %v314_v12 = vsel %vm313_vm11, %v308_v6, %v311_v8  ;;  %v209_v13 = vsel %vm208_vm6, %v203_v7, %v206_v9  ;;  %vm781_vm6 = vcmask 916480  }
  0xa2   :  { %318 = vst [vmem:[#allocation2 + $0x68] sm:$0xf] %v314_v12  ;;  %v189_v17 = vsel %vm187_vm5, %v184_v10, %v186_v11  ;;  %v2005_v11 = vld [vmem:[%s3357_s1 + $0x10] sm:$0xf]  ;;  %v2122_v12 = vld [vmem:[%s3357_s1 + $0x14] sm:$0xf0] }
  0xa3   :  { %213 = vst [vmem:[#allocation2 + $0x40] sm:$0xf] %v209_v13  ;;  %v2129_v34 = vld [vmem:[#allocation2 + $0x30] sm:$0xff] }
  0xa4   :  { %193 = vst [vmem:[#allocation2 + $0x3c] sm:$0xf] %v189_v17 }
  0xa6   :  { %v331_v18 = vpop.permute.xlu2 %330  ;;  %v226_v19 = vpop.permute.xlu1 %225 }
  0xa7   :  { %v333_v22 = vrot.slane %v331_v18, 4  ;;  %v228_v23 = vrot.slane %v226_v19, 4  ;;  %v224_v24 = vpop.permute.xlu0 %223 }
  0xa8   :  { %v227_v25 = vrot.slane %v224_v24, 4 }
  0xa9   :  { %v336_v26 = vsel %vm334_vm12, %v331_v18, %v333_v22  ;;  %v231_v27 = vsel %vm229_vm13, %v226_v19, %v228_v23  ;;  %v2006_v19 = vor.u32 %v2122_v12, %v2005_v11 }
  0xaa   :  { %340 = vst [vmem:[#allocation2 + $0x74] sm:$0xf] %v336_v26  ;;  %v230_v28 = vsel %vm229_vm13, %v224_v24, %v227_v25  ;;  %vm1454_vm13 = vcmask 261120  }
  0xab   :  { %235 = vst [vmem:[#allocation2 + $0x4c] sm:$0xf] %v231_v27  ;;  %v2130_v29 = vld [vmem:[#allocation2 + $0x38] sm:$0xff] }
  0xac   :  { %234 = vst [vmem:[#allocation2 + $0x48] sm:$0xf] %v230_v28  ;;  %538 = vmatpush.bf16.msra.mxu0 %v2130_v29 }
  0xae   :  { %v2428_v30 = vpop.permute.xlu2 %404  ;;  %v266_v31 = vpop.permute.xlu1 %265 }
  0xaf   :  { %v269_v32 = vrot.slane %v266_v31, 4  ;;  %v247_v33 = vpop.permute.xlu0 %246 }
  0xb0   :  { %v249_v35 = vrot.slane %v247_v33, 4  ;;  %539 = vmatpush.bf16.msra.mxu0 %v2129_v34  ;;  %v1999_v34 = vld [vmem:[%s3357_s1 + $0x8] sm:$0xf0] }
  0xb1   :  { %v272_v36 = vsel %vm271_vm9, %v266_v31, %v269_v32  ;;  %vm988_vm9 = vcmask 719872  }
  0xb2   :  { %276 = vst [vmem:[#allocation2 + $0x58] sm:$0xf] %v272_v36  ;;  %v252_v37 = vsel %vm250_vm8, %v247_v33, %v249_v35  ;;  %v2119_v33 = vld [vmem:[%s3357_s1 + $0x4] sm:$0xf]  ;;  %vm919_vm8 = vcmask 785408  }
  0xb3   :  { %256 = vst [vmem:[#allocation2 + $0x54] sm:$0xf] %v252_v37  ;;  %v2132_v32 = vld [vmem:[#allocation2 + $0x48] sm:$0xff]  ;;  %v2131_v35 = vld [vmem:[#allocation2 + $0x40] sm:$0xff]  ;;  %v2002_v36 = vor.u32 %v2119_v33, %v1999_v34  ;;  %v2121_v37 = vld [vmem:[%s3357_s1 + $0x14] sm:$0xf] }
  0xb4   :  { %540 = vmatpush.bf16.msra.mxu0 %v2128_v38  ;;  %v2007_v38 = vld [vmem:[%s3357_s1 + $0x18] sm:$0xf0]  ;;  %s2289_s1 = smov 112  }
  0xb6   :  { %v2432_v39 = vpop.permute.xlu2 %419  ;;  %v289_v40 = vpop.permute.xlu1 %288 }
  0xb7   :  { %v291_v41 = vrot.slane %v289_v40, 4  ;;  %v287_v42 = vpop.permute.xlu0 %286 }
  0xb8   :  { %v290_v44 = vrot.slane %v287_v42, 4  ;;  %541 = vmatpush.bf16.msra.mxu0 %v2127_v43 }
  0xb9   :  { %v294_v45 = vsel %vm292_vm14, %v289_v40, %v291_v41  ;;  %v2134_v27 = vld [vmem:[#allocation2 + $0x58] sm:$0xff]  ;;  %v2010_v40 = vor.u32 %v2121_v37, %v2007_v38  ;;  %v2288_v41 = vmov 3  }
  0xba   :  { %298 = vst [vmem:[#allocation2 + $0x64] sm:$0xf] %v294_v45  ;;  %v293_v47 = vsel %vm292_vm14, %v287_v42, %v290_v44  ;;  %v2133_v28 = vld [vmem:[#allocation2 + $0x50] sm:$0xff]  ;;  %vm1523_vm14 = vcmask 195584  }
  0xbb   :  { %297 = vst [vmem:[#allocation2 + $0x60] sm:$0xf] %v293_v47 }
  0xbc   :  { %542 = vmatpush.bf16.msra.mxu0 %v2126_v48 }
  0xbe   :  { %v2434_v49 = vpop.permute.xlu2 %635  ;;  %v329_v50 = vpop.permute.xlu1 %328 }
  0xbf   :  { %v332_v51 = vrot.slane %v329_v50, 4  ;;  %v310_v52 = vpop.permute.xlu0 %309 }
  0xc0   :  { %v312_v54 = vrot.slane %v310_v52, 4  ;;  %543 = vmatpush.bf16.msra.mxu0 %v2125_v53 }
  0xc1   :  { %v335_v55 = vsel %vm334_vm12, %v329_v50, %v332_v51  ;;  %vm1385_vm12 = vcmask 326656  }
  0xc2   :  { %339 = vst [vmem:[#allocation2 + $0x70] sm:$0xf] %v335_v55  ;;  %v315_v56 = vsel %vm313_vm11, %v310_v52, %v312_v54  ;;  %v2135_v24 = vld [vmem:[#allocation2 + $0x60] sm:$0xff]  ;;  %v2290_v55 = vmov 4   ;;  %vm1316_vm11 = vcmask 392192  }
  0xc3   :  { %319 = vst [vmem:[#allocation2 + $0x6c] sm:$0xf] %v315_v56 }
  0xc4   :  { %544 = vmatpush.bf16.msra.mxu0 %v2124_v57 }
  0xc6   :  { %v352_v60 = vpop.permute.xlu1 %351 }
  0xc7   :  { %v354_v61 = vrot.slane %v352_v60, 4  ;;  %v350_v62 = vpop.permute.xlu0 %349  ;;  %v2444_v63 = vpop.permute.xlu2 %665 }
  0xc8   :  { %v353_v1 = vrot.slane %v350_v62, 4  ;;  %v680_v2 = vmul.f32 0.0, %v2444_v63  ;;  %545 = vmatpush.bf16.msra.mxu0 %v2123_v0 }
  0xc9   :  { %v357_v4 = vsel %vm355_vm15, %v352_v60, %v354_v61  ;;  %v2137_v17 = vld [vmem:[#allocation2 + $0x70] sm:$0xff] }
  0xca   :  { %361 = vst [vmem:[#allocation2 + $0x7c] sm:$0xf] %v357_v4  ;;  %v356_v5 = vsel %vm355_vm15, %v350_v62, %v353_v1  ;;  %696 = vrot.lane.b32.xlu1 %v680_v2, %s2287_s21  ;;  %v2136_v22 = vld [vmem:[#allocation2 + $0x68] sm:$0xff] }
  0xcb   :  { %360 = vst [vmem:[#allocation2 + $0x78] sm:$0xf] %v356_v5  ;;  %546 = vmatmul.bf16.vlgmr.msra.gmra.mxu0 %v1998_v3 }
  0xce   :  { %v2450_v6 = vpop.permute.xlu1 %414 }
  0xcf   :  { %v2452_v7 = vpop.permute.xlu2 %677  ;;  %v2454_v8 = vpop.permute.xlu0 %409 }
  0xd0   :  { %v686_v9 = vmul.f32 0.0, %v2452_v7 }
  0xd2   :  { %708 = vrot.lane.b32.xlu1 %v686_v9, %s2287_s21  ;;  %v2138_v10 = vld [vmem:[#allocation2 + $0x78] sm:$0xff]  ;;  %v2292_v9 = vmov 5  }
  0xd3   :  { %557 = vmatpush.bf16.msra.mxu1 %v2138_v10 }
  0xd6   :  { %v2464_v13 = vpop.permute.xlu1 %630 }
  0xd7   :  { %v2466_v18 = vpop.permute.xlu0 %640  ;;  %558 = vmatpush.bf16.msra.mxu1 %v2137_v17 }
  0xda   :  { %738 = vperm.xlu1 %2199, %v2384_v14  }
  0xdb   :  { %551 = vmatmul.bf16.gmra.mxu0 %v2006_v19  ;;  %559 = vmatpush.bf16.msra.mxu1 %v2136_v22 }
  0xde   :  { %v2469_v23 = vpop.permute.xlu1 %645 }
  0xdf   :  { %560 = vmatpush.bf16.msra.mxu1 %v2135_v24 }
  0xe0   :  { %v2471_v25 = vpop.permute.xlu0 %669 }
  0xe1   :  { %v682_v26 = vmul.f32 0.0, %v2471_v25 }
  0xe2   :  { %746 = vperm.xlu1 %2199, %v2402_v20  }
  0xe3   :  { %700 = vrot.lane.b32.xlu0 %v682_v26, %s2287_s21  ;;  %561 = vmatpush.bf16.msra.mxu1 %v2134_v27 }
  0xe7   :  { %v2476_v29 = vpop.permute.xlu1 %673  ;;  %562 = vmatpush.bf16.msra.mxu1 %v2133_v28 }
  0xe8   :  { %v684_v31 = vmul.f32 0.0, %v2476_v29 }
  0xea   :  { %704 = vrot.lane.b32.xlu2 %v684_v31, %s2287_s21  ;;  %2201 = vset.pattern.permute.xlu1 %v2288_v41 }
  0xeb   :  { %734 = vperm.xlu0 %2198, %v2389_v15   ;;  %563 = vmatpush.bf16.msra.mxu1 %v2132_v32  ;;  %v2294_v32 = vmov 6  }
  0xef   :  { %564 = vmatpush.bf16.msra.mxu1 %v2131_v35 }
  0xf2   :  { %742 = vperm.xlu2 %2200, %v2394_v16   ;;  %565 = vmatmul.bf16.vlgmr.msra.gmra.mxu1 %v2002_v36 }
  0xf3   :  { %2203 = vset.pattern.permute.xlu0 %v2288_v41 }
  0xfa   :  { %2202 = vset.pattern.permute.xlu2 %v2288_v41 }
 0x102   :  { %570 = vmatmul.bf16.gmra.mxu1 %v2010_v40 }
 0x13c   :  { %v2494_v42 = vpop.permute.xlu1 %696 }
 0x144   :  { %v2496_v43 = vpop.permute.xlu2 %704  ;;  %v2498_v44 = vpop.permute.xlu1 %708 }
 0x148   :  { %v547_v34 = vpop.f32.mrf.mxu0 }
 0x149   :  { %v548_v36 = vadd.f32 %v547_v34, %v2428_v30 }
 0x14c   :  { %v2500_v45 = vpop.permute.xlu2 %742  ;;  %v2502_v46 = vpop.permute.xlu1 %738 }
 0x14d   :  { %v753_v47 = vmul.f32 0.0, %v2500_v45  ;;  %v751_v48 = vmul.f32 0.0, %v2502_v46 }
 0x14f   :  { %769 = vrot.lane.b32.xlu1 %v751_v48, %s2289_s1  ;;  %773 = vrot.lane.b32.xlu0 %v753_v47, %s2289_s1 }
 0x154   :  { %v2517_v53 = vpop.permute.xlu1 %746 }
 0x155   :  { %v2508_v50 = vpop.permute.xlu0 %700  ;;  %v755_v54 = vmul.f32 0.0, %v2517_v53 }
 0x157   :  { %803 = vperm.xlu1 %2201, %v2389_v15   ;;  %811 = vperm.xlu0 %2203, %v2394_v16  }
 0x15d   :  { %v2512_v51 = vpop.permute.xlu0 %734 }
 0x15e   :  { %v749_v52 = vmul.f32 0.0, %v2512_v51 }
 0x15f   :  { %815 = vperm.xlu1 %2201, %v2402_v20   ;;  %2205 = vset.pattern.permute.xlu0 %v2290_v55 }
 0x160   :  { %765 = vrot.lane.b32.xlu2 %v749_v52, %s2289_s1  ;;  %v549_v52 = vpop.f32.mrf.mxu0 }
 0x161   :  { %v550_v30 = vadd.f32 %v549_v52, %v2454_v8 }
 0x167   :  { %2206 = vset.pattern.permute.xlu1 %v2290_v55 }
 0x168   :  { %777 = vrot.lane.b32.xlu2 %v755_v54, %s2289_s1 }
 0x16f   :  { %v566_v35 = vpop.f32.mrf.mxu1 }
 0x170   :  { %807 = vperm.xlu2 %2202, %v2384_v14   ;;  %v567_v37 = vadd.f32 %v566_v35, %v548_v36 }
 0x172   :  { %v580_v47 = vmin.f32 %v567_v37, 0.0  ;;  %vm576_vm0 = vcmp.gt.f32.partialorder %v567_v37, 0.0 }
 0x174   :  { %v584_v48 = vmul.f32 1.442695, %v580_v47 }
 0x176   :  { %2250 = vpow2.f32 %v584_v48 }
 0x178   :  { %2204 = vset.pattern.permute.xlu2 %v2290_v55  ;;  %v568_v55 = vpop.f32.mrf.mxu1 }
 0x1ba   :  { %v2522_v56 = vpop.permute.xlu2 %765 }
 0x1c1   :  { %v2524_v57 = vpop.permute.xlu1 %769  ;;  %v2526_v58 = vpop.permute.xlu0 %773 }
 0x1c2   :  { %v2528_v59 = vpop.permute.xlu2 %777 }
 0x1c9   :  { %v2530_v60 = vpop.permute.xlu1 %803  ;;  %v2532_v61 = vpop.permute.xlu0 %811 }
 0x1ca   :  { %v818_v62 = vmul.f32 0.0, %v2530_v60  ;;  %v822_v0 = vmul.f32 0.0, %v2532_v61  ;;  %v2538_v1 = vpop.permute.xlu2 %807 }
 0x1cb   :  { %v820_v2 = vmul.f32 0.0, %v2538_v1 }
 0x1cc   :  { %834 = vrot.lane.b32.xlu2 %v818_v62, %s2291_s12  ;;  %842 = vrot.lane.b32.xlu1 %v822_v0, %s2291_s12  ;;  %v2251_v0 = vpop.eup %2250 }
 0x1d1   :  { %v2541_v3 = vpop.permute.xlu1 %815 }
 0x1d2   :  { %v824_v4 = vmul.f32 0.0, %v2541_v3 }
 0x1d4   :  { %846 = vrot.lane.b32.xlu0 %v824_v4, %s2291_s12  ;;  %838 = vrot.lane.b32.xlu2 %v820_v2, %s2291_s12  ;;  %v569_v2 = vadd.f32 %v568_v55, %v550_v30 }
 0x1d5   :  { %880 = vperm.xlu1 %2206, %v2394_v16  }
 0x1d6   :  { %v581_v34 = vmin.f32 %v569_v2, 0.0  ;;  %vm577_vm1 = vcmp.gt.f32.partialorder %v569_v2, 0.0 }
 0x1dc   :  { %876 = vperm.xlu0 %2205, %v2384_v14   ;;  %872 = vperm.xlu2 %2204, %v2389_v15  }
 0x1dd   :  { %2208 = vset.pattern.permute.xlu1 %v2292_v9 }
 0x1e4   :  { %884 = vperm.xlu2 %2204, %v2402_v20   ;;  %2207 = vset.pattern.permute.xlu0 %v2292_v9 }
 0x1ec   :  { %2209 = vset.pattern.permute.xlu2 %v2292_v9  ;;  %v552_v9 = vpop.f32.mrf.mxu0 }
 0x226   :  { %v2550_v5 = vpop.permute.xlu2 %834 }
 0x22e   :  { %v2552_v10 = vpop.permute.xlu2 %838 }
 0x236   :  { %v2554_v11 = vpop.permute.xlu2 %872 }
 0x237   :  { %v887_v12 = vmul.f32 0.0, %v2554_v11 }
 0x239   :  { %903 = vrot.lane.b32.xlu1 %v887_v12, %s2293_s13  ;;  %v2075_v12 = vadd.f32 -1.0, %v2251_v0  ;;  %v554_v0 = vpop.f32.mrf.mxu0 }
 0x23b   :  { %v2601_v35 = vsel %vm576_vm0, %v567_v37, %v2075_v12  ;;  %vm1592_vm0 = vcmask 130048  }
 0x23c   :  { %v750_v48 = vmul.f32 %v2512_v51, %v2601_v35  ;;  %v555_v51 = vadd.f32 %v554_v0, %v2432_v39 }
 0x23e   :  { %v2558_v17 = vpop.permute.xlu2 %884  ;;  %v2560_v19 = vpop.permute.xlu1 %842 }
 0x23f   :  { %v893_v22 = vmul.f32 0.0, %v2558_v17 }
 0x241   :  { %915 = vrot.lane.b32.xlu1 %v893_v22, %s2293_s13  ;;  %v571_v22 = vpop.f32.mrf.mxu1 }
 0x246   :  { %v2564_v24 = vpop.permute.xlu0 %846 }
 0x247   :  { %v2566_v26 = vpop.permute.xlu1 %880 }
 0x248   :  { %v891_v27 = vmul.f32 0.0, %v2566_v26 }
 0x249   :  { %945 = vperm.xlu1 %2208, %v2384_v14  }
 0x24a   :  { %911 = vrot.lane.b32.xlu2 %v891_v27, %s2293_s13  ;;  %v2296_v27 = vmov 7  }
 0x24e   :  { %v2571_v28 = vpop.permute.xlu0 %876 }
 0x24f   :  { %v889_v31 = vmul.f32 0.0, %v2571_v28 }
 0x251   :  { %953 = vperm.xlu1 %2208, %v2402_v20   ;;  %907 = vrot.lane.b32.xlu0 %v889_v31, %s2293_s13  ;;  %v553_v31 = vadd.f32 %v552_v9, %v2450_v6 }
 0x252   :  { %949 = vperm.xlu2 %2209, %v2394_v16  }
 0x253   :  { %v572_v8 = vadd.f32 %v571_v22, %v553_v31 }
 0x255   :  { %v582_v47 = vmin.f32 %v572_v8, 0.0  ;;  %vm578_vm2 = vcmp.gt.f32.partialorder %v572_v8, 0.0 }
 0x257   :  { %v588_v6 = vmul.f32 1.442695, %v582_v47 }
 0x259   :  { %941 = vperm.xlu0 %2207, %v2389_v15   ;;  %2210 = vset.pattern.permute.xlu1 %v2294_v32 }
 0x25a   :  { %2211 = vset.pattern.permute.xlu2 %v2294_v32 }
 0x261   :  { %2224 = vset.pattern.permute.xlu0 %v2294_v32 }
 0x2a4   :  { %v2581_v33 = vpop.permute.xlu2 %911 }
 0x2a5   :  { %3369 = vst [vmem:[#allocation4_spill] sm:$0xff] %v2581_v33  ;;  %v3374_v33 = vmov 1  }
 0x2ab   :  { %v2584_v38 = vpop.permute.xlu1 %903 }
 0x2ac   :  { %v2586_v40 = vpop.permute.xlu2 %949 }
 0x2ad   :  { %v960_v41 = vmul.f32 0.0, %v2586_v40 }
 0x2af   :  { %980 = vrot.lane.b32.xlu0 %v960_v41, %s2295_s14  ;;  %v586_v41 = vmul.f32 1.442695, %v581_v34 }
 0x2b1   :  { %2252 = vpow2.f32 %v586_v41 }
 0x2b2   :  { %2254 = vpow2.f32 %v588_v6 }
 0x2b3   :  { %v2590_v54 = vpop.permute.xlu1 %915 }
 0x2b7   :  { %1022 = vperm.xlu0 %2224, %v2402_v20   ;;  %v2253_v37 = vpop.eup %2252 }
 0x2b8   :  { %v2076_v9 = vadd.f32 -1.0, %v2253_v37  ;;  %v2255_v22 = vpop.eup %2254 }
 0x2b9   :  { %v2077_v47 = vadd.f32 -1.0, %v2255_v22  ;;  %v888_v22 = vmul.f32 %v2554_v11, %v2601_v35 }
 0x2ba   :  { %v2615_v31 = vsel %vm577_vm1, %v569_v2, %v2076_v9  ;;  %v2298_v2 = vmov 10   ;;  %vm1661_vm1 = vcmask 64512  }
 0x2bb   :  { %v2594_v62 = vpop.permute.xlu1 %945  ;;  %v821_v41 = vmul.f32 %v2538_v1, %v2615_v31  ;;  %v2623_v6 = vsel %vm578_vm2, %v572_v8, %v2077_v47  ;;  %v683_v9 = vmul.f32 %v2471_v25, %v2615_v31  ;;  %v752_v11 = vmul.f32 %v2502_v46, %v2615_v31 }
 0x2bc   :  { %v958_v4 = vmul.f32 0.0, %v2594_v62  ;;  %v685_v1 = vmul.f32 %v2476_v29, %v2623_v6  ;;  %v892_v8 = vmul.f32 %v2566_v26, %v2623_v6  ;;  %v2300_v29 = vmov 11  }
 0x2bd   :  { %v2301_v26 = vmov 12  }
 0x2be   :  { %976 = vrot.lane.b32.xlu1 %v958_v4, %s2295_s14  ;;  %v573_v4 = vpop.f32.mrf.mxu1 }
 0x2bf   :  { %2225 = vset.pattern.permute.xlu0 %v2296_v27  ;;  %v574_v12 = vadd.f32 %v573_v4, %v555_v51  ;;  %v3364_v4 = vmov 13   ;;  %v819_v51 = vmul.f32 %v2530_v60, %v2601_v35  ;;  %v890_v60 = vmul.f32 %v2571_v28, %v2615_v31 }
 0x2c0   :  { %1079 = vperm.xlu0 %2225, %v2389_v15   ;;  %v754_v28 = vmul.f32 %v2500_v45, %v2623_v6 }
 0x2c1   :  { %v583_v34 = vmin.f32 %v574_v12, 0.0  ;;  %vm579_vm3 = vcmp.gt.f32.partialorder %v574_v12, 0.0 }
 0x2c3   :  { %v2603_v36 = vpop.permute.xlu0 %907  ;;  %v590_v39 = vmul.f32 1.442695, %v583_v34 }
 0x2c5   :  { %2256 = vpow2.f32 %v590_v39 }
 0x2c6   :  { %1010 = vperm.xlu1 %2210, %v2389_v15  }
 0x2c8   :  { %767 = vrot.lane.b32.xlu0 %v750_v48, %s2289_s1  ;;  %v2297_v48 = vmov 8  }
 0x2cb   :  { %v942_v52 = vpop.permute.xlu0 %941 }
 0x2cc   :  { %v956_v55 = vmul.f32 0.0, %v942_v52  ;;  %v957_v30 = vmul.f32 %v942_v52, %v2601_v35  ;;  %v2257_v52 = vpop.eup %2256 }
 0x2ce   :  { %2212 = vset.pattern.permute.xlu1 %v2296_v27  ;;  %972 = vrot.lane.b32.xlu2 %v956_v55, %s2295_s14  ;;  %v2078_v55 = vadd.f32 -1.0, %v2257_v52 }
 0x2cf   :  { %1083 = vperm.xlu1 %2212, %v2384_v14  }
 0x2d0   :  { %974 = vrot.lane.b32.xlu0 %v957_v30, %s2295_s14  ;;  %v2299_v30 = vmov 9   ;;  %v2639_v0 = vsel %vm579_vm3, %v574_v12, %v2078_v55  ;;  %v3363_v12 = vmov 15  }
 0x2d1   :  { %v756_v37 = vmul.f32 %v2517_v53, %v2639_v0  ;;  %v3362_v53 = vmov 14   ;;  %v825_v47 = vmul.f32 %v2541_v3, %v2639_v0  ;;  %v959_v3 = vmul.f32 %v2594_v62, %v2615_v31 }
 0x2d6   :  { %1014 = vperm.xlu2 %2211, %v2384_v14  }
 0x2d7   :  { %2214 = vset.pattern.permute.xlu1 %v2297_v48 }
 0x2d8   :  { %840 = vrot.lane.b32.xlu0 %v821_v41, %s2291_s12  ;;  %1135 = vperm.xlu1 %2214, %v2384_v14  }
 0x2de   :  { %2213 = vset.pattern.permute.xlu2 %v2297_v48 }
 0x2df   :  { %1131 = vperm.xlu2 %2213, %v2389_v15  }
 0x2e0   :  { %706 = vrot.lane.b32.xlu0 %v685_v1, %s2287_s21  ;;  %2216 = vset.pattern.permute.xlu1 %v2298_v2 }
 0x2e1   :  { %1269 = vperm.xlu1 %2216, %v2389_v15  }
 0x2e7   :  { %2215 = vset.pattern.permute.xlu2 %v2299_v30 }
 0x2e8   :  { %913 = vrot.lane.b32.xlu0 %v892_v8, %s2293_s13  ;;  %1200 = vperm.xlu2 %2215, %v2389_v15  }
 0x2e9   :  { %2218 = vset.pattern.permute.xlu1 %v2300_v29 }
 0x2ea   :  { %1338 = vperm.xlu1 %2218, %v2389_v15  }
 0x2f0   :  { %779 = vrot.lane.b32.xlu0 %v756_v37, %s2289_s1  ;;  %2217 = vset.pattern.permute.xlu2 %v2298_v2  ;;  %v823_v37 = vmul.f32 %v2532_v61, %v2623_v6 }
 0x2f1   :  { %1273 = vperm.xlu2 %2217, %v2384_v14  }
 0x2f2   :  { %2220 = vset.pattern.permute.xlu1 %v2301_v26 }
 0x2f3   :  { %1411 = vperm.xlu1 %2220, %v2384_v14  }
 0x2f8   :  { %1087 = vperm.xlu0 %2225, %v2394_v16  }
 0x2f9   :  { %2219 = vset.pattern.permute.xlu2 %v2300_v29 }
 0x2fa   :  { %1342 = vperm.xlu2 %2219, %v2384_v14  }
 0x2fb   :  { %2222 = vset.pattern.permute.xlu1 %v3364_v4 }
 0x2fc   :  { %1480 = vperm.xlu1 %2222, %v2384_v14  }
 0x300   :  { %2230 = vset.pattern.permute.xlu0 %v2299_v30 }
 0x301   :  { %1204 = vperm.xlu0 %2230, %v2384_v14  }
 0x302   :  { %2221 = vset.pattern.permute.xlu2 %v3364_v4 }
 0x303   :  { %1476 = vperm.xlu2 %2221, %v2389_v15  }
 0x304   :  { %2226 = vset.pattern.permute.xlu1 %v3362_v53 }
 0x305   :  { %1545 = vperm.xlu1 %2226, %v2389_v15  }
 0x309   :  { %1212 = vperm.xlu0 %2230, %v2402_v20  }
 0x30b   :  { %2223 = vset.pattern.permute.xlu2 %v2294_v32  ;;  %v681_v32 = vmul.f32 %v2444_v63, %v2601_v35  ;;  %v2691_v63 = vpop.permute.xlu1 %953 }
 0x30c   :  { %1018 = vperm.xlu2 %2223, %v2394_v16  }
 0x30d   :  { %836 = vrot.lane.b32.xlu1 %v819_v51, %s2291_s12 }
 0x30e   :  { %2228 = vset.pattern.permute.xlu1 %v3363_v12 }
 0x311   :  { %2235 = vset.pattern.permute.xlu0 %v2301_v26 }
 0x312   :  { %1407 = vperm.xlu0 %2235, %v2389_v15  }
 0x314   :  { %2227 = vset.pattern.permute.xlu2 %v3362_v53 }
 0x315   :  { %1549 = vperm.xlu2 %2227, %v2384_v14   ;;  %702 = vrot.lane.b32.xlu1 %v683_v9, %s2287_s21 }
 0x31a   :  { %1415 = vperm.xlu0 %2235, %v2394_v16  }
 0x31d   :  { %698 = vrot.lane.b32.xlu2 %v681_v32, %s2287_s21  ;;  %909 = vrot.lane.b32.xlu1 %v890_v60, %s2293_s13  ;;  %v687_v60 = vmul.f32 %v2452_v7, %v2639_v0  ;;  %v894_v32 = vmul.f32 %v2558_v17, %v2639_v0 }
 0x31e   :  { %2229 = vset.pattern.permute.xlu2 %v3363_v12 }
 0x321   :  { %v2681_v25 = vpop.permute.xlu0 %980 }
 0x322   :  { %3370 = vst [vmem:[#allocation5_spill] sm:$0xff] %v2681_v25  ;;  %2244 = vset.pattern.permute.xlu0 %v3362_v53  ;;  %v648_v53 = vmul.f32 0.0, %v2464_v13 }
 0x323   :  { %1557 = vperm.xlu0 %2244, %v2402_v20  }
 0x325   :  { %905 = vrot.lane.b32.xlu2 %v888_v22, %s2293_s13  ;;  %775 = vrot.lane.b32.xlu1 %v754_v28, %s2289_s1 }
 0x328   :  { %v2693_v34 = vpop.permute.xlu2 %972 }
 0x329   :  { %3371 = vst [vmem:[#allocation6_spill] sm:$0xff] %v2693_v34  ;;  %v2695_v41 = vpop.permute.xlu0 %1022 }
 0x32b   :  { %2247 = vset.pattern.permute.xlu0 %v3365_v21 }
 0x32d   :  { %771 = vrot.lane.b32.xlu2 %v752_v11, %s2289_s1  ;;  %848 = vrot.lane.b32.xlu1 %v825_v47, %s2291_s12 }
 0x330   :  { %v2704_v45 = vpop.permute.xlu1 %976  ;;  %v2706_v39 = vpop.permute.xlu2 %1014 }
 0x331   :  { %v1027_v1 = vmul.f32 0.0, %v2706_v39 }
 0x332   :  { %v2709_v52 = vpop.permute.xlu0 %1079 }
 0x333   :  { %1045 = vrot.lane.b32.xlu0 %v1027_v1, %s2305_s16 }
 0x335   :  { %978 = vrot.lane.b32.xlu2 %v959_v3, %s2295_s14  ;;  %1614 = vperm.xlu1 %2228, %v2389_v15  }
 0x338   :  { %v2716_v46 = vpop.permute.xlu1 %1010 }
 0x339   :  { %v2718_v8 = vpop.permute.xlu2 %1131 }
 0x33a   :  { %v2720_v55 = vpop.permute.xlu0 %767 }
 0x33d   :  { %844 = vrot.lane.b32.xlu2 %v823_v37, %s2291_s12  ;;  %2231 = vset.pattern.permute.xlu1 %v2296_v27 }
 0x33e   :  { %1091 = vperm.xlu1 %2231, %v2402_v20  }
 0x341   :  { %v1084_v62 = vpop.permute.xlu1 %1083 }
 0x342   :  { %v1095_v51 = vmul.f32 %v1084_v62, %v2615_v31  ;;  %v2728_v9 = vpop.permute.xlu0 %974  ;;  %v2730_v15 = vpop.permute.xlu2 %1200 }
 0x343   :  { %3372 = vst [vmem:[#allocation7_spill] sm:$0xff] %v2728_v9  ;;  %v1216_v47 = vmul.f32 0.0, %v2730_v15 }
 0x344   :  { %1104 = vrot.lane.b32.xlu0 %v1095_v51, %s2306_s0 }
 0x345   :  { %710 = vrot.lane.b32.xlu2 %v687_v60, %s2287_s21 }
 0x346   :  { %2233 = vset.pattern.permute.xlu1 %v2297_v48 }
 0x347   :  { %1143 = vperm.xlu1 %2233, %v2402_v20  }
 0x34a   :  { %v2738_v61 = vpop.permute.xlu0 %840  ;;  %v2740_v27 = vpop.permute.xlu1 %1135 }
 0x34b   :  { %v1148_v22 = vmul.f32 %v2740_v27, %v2615_v31  ;;  %v2746_v7 = vpop.permute.xlu2 %1273 }
 0x34c   :  { %v1287_v51 = vmul.f32 0.0, %v2746_v7 }
 0x34d   :  { %917 = vrot.lane.b32.xlu2 %v894_v32, %s2293_s13  ;;  %1166 = vrot.lane.b32.xlu0 %v1148_v22, %s2274_s15 }
 0x34f   :  { %2236 = vset.pattern.permute.xlu1 %v2298_v2 }
 0x350   :  { %1277 = vperm.xlu1 %2236, %v2394_v16  }
 0x352   :  { %v2752_v28 = vpop.permute.xlu0 %706 }
 0x353   :  { %v2755_v11 = vpop.permute.xlu1 %1269 }
 0x354   :  { %v2757_v17 = vpop.permute.xlu2 %1342  ;;  %v1284_v3 = vmul.f32 %v2755_v11, %v2601_v35 }
 0x355   :  { %1618 = vperm.xlu2 %2229, %v2384_v14   ;;  %1233 = vrot.lane.b32.xlu0 %v1216_v47, %s2284_s25  ;;  %v1355_v32 = vmul.f32 %v2757_v17, %v2615_v31  ;;  %v2806_v47 = vld [vmem:[%s3356_s3 + $0x18] sm:$0xff] }
 0x358   :  { %2238 = vset.pattern.permute.xlu1 %v2300_v29 }
 0x359   :  { %1346 = vperm.xlu1 %2238, %v2394_v16  }
 0x35a   :  { %v2763_v1 = vpop.permute.xlu0 %913 }
 0x35b   :  { %3373 = vst [vmem:[#allocation8_spill] sm:$0xff] %v2763_v1 }
 0x35c   :  { %v2767_v37 = vpop.permute.xlu1 %1338 }
 0x35d   :  { %2232 = vset.pattern.permute.xlu2 %v2297_v48  ;;  %v2770_v62 = vpop.permute.xlu2 %1476  ;;  %1300 = vrot.lane.b32.xlu0 %v1284_v3, %s2307_s17 }
 0x35e   :  { %1139 = vperm.xlu2 %2232, %v2394_v16   ;;  %v2788_v16 = vld [vmem:[%s3356_s3 + $0x10] sm:$0xff]  ;;  %s2309_s3 = smov 32  }
 0x361   :  { %2240 = vset.pattern.permute.xlu1 %v2301_v26 }
 0x362   :  { %v2775_v14 = vpop.permute.xlu0 %779  ;;  %1419 = vperm.xlu1 %2240, %v2402_v20  }
 0x365   :  { %v2779_v60 = vpop.permute.xlu1 %1411  ;;  %1306 = vrot.lane.b32.xlu0 %v1287_v51, %s2307_s17 }
 0x366   :  { %2234 = vset.pattern.permute.xlu2 %v2299_v30  ;;  %v2783_v48 = vpop.permute.xlu2 %1018 }
 0x367   :  { %1208 = vperm.xlu2 %2234, %v2788_v16  }
 0x36a   :  { %v2791_v26 = vpop.permute.xlu0 %1087  ;;  %2242 = vset.pattern.permute.xlu1 %v3364_v4 }
 0x36b   :  { %1488 = vperm.xlu1 %2242, %v2402_v20  }
 0x36d   :  { %1373 = vrot.lane.b32.xlu0 %v1355_v32, %s2308_s20 }
 0x36e   :  { %v2798_v30 = vpop.permute.xlu1 %1480 }
 0x36f   :  { %2237 = vset.pattern.permute.xlu2 %v2298_v2  ;;  %v2801_v22 = vpop.permute.xlu2 %1549  ;;  %v649_v2 = vmul.f32 %v2464_v13, %v2601_v35 }
 0x370   :  { %1281 = vperm.xlu2 %2237, %v2806_v47  }
 0x373   :  { %v2809_v3 = vpop.permute.xlu0 %1204  ;;  %2245 = vset.pattern.permute.xlu1 %v3363_v12  ;;  %v1025_v12 = vmul.f32 0.0, %v2716_v46 }
 0x374   :  { %1622 = vperm.xlu1 %2245, %v2788_v16  }
 0x377   :  { %v2813_v20 = vpop.permute.xlu1 %1545  ;;  %v699_v51 = vpop.permute.xlu2 %698 }
 0x378   :  { %v713_v32 = vsel %vm712_vm4, %v2494_v42, %v699_v51  ;;  %2239 = vset.pattern.permute.xlu2 %v2300_v29  ;;  %v726_v4 = vadd.f32 %v699_v51, %v649_v2  ;;  %v782_v42 = vsel %vm781_vm6, %v2522_v56, %v2720_v55 }
 0x379   :  { %1350 = vperm.xlu2 %2239, %v2806_v47   ;;  %v725_v21 = vadd.f32 %v713_v32, %v648_v53  ;;  %v3375_v32 = vmov 13  }
 0x37a   :  { %v795_v29 = vadd.f32 %v2720_v55, %v726_v4  ;;  %v651_v55 = vmul.f32 %v2434_v49, %v2615_v31 }
 0x37b   :  { %v2823_v25 = vpop.permute.xlu0 %1212  ;;  %v794_v1 = vadd.f32 %v782_v42, %v725_v21 }
 0x37c   :  { %1041 = vrot.lane.b32.xlu1 %v1025_v12, %s2305_s16  ;;  %v1028_v12 = vmul.f32 %v2706_v39, %v2615_v31  ;;  %v650_v39 = vmul.f32 0.0, %v2434_v49 }
 0x37d   :  { %2248 = vset.pattern.permute.xlu1 %v3374_v33 }
 0x37f   :  { %v837_v13 = vpop.permute.xlu1 %836  ;;  %v906_v34 = vpop.permute.xlu2 %905 }
 0x380   :  { %v851_v51 = vsel %vm850_vm7, %v2550_v5, %v837_v13  ;;  %v864_v53 = vadd.f32 %v837_v13, %v795_v29  ;;  %v920_v56 = vsel %vm919_vm8, %v2584_v38, %v906_v34  ;;  %v1146_v13 = vmul.f32 %v2718_v8, %v2601_v35 }
 0x381   :  { %v863_v2 = vadd.f32 %v851_v51, %v794_v1  ;;  %2241 = vset.pattern.permute.xlu2 %v3375_v32  ;;  %v961_v32 = vmul.f32 %v2586_v40, %v2623_v6 }
 0x382   :  { %v2838_v9 = vadd.f32 %v906_v34, %v864_v53  ;;  %1484 = vperm.xlu2 %2241, %v2788_v16  }
 0x383   :  { %v2841_v21 = vadd.f32 %v920_v56, %v863_v2  ;;  %v3376_v2 = vmov 14  }
 0x384   :  { %v2843_v4 = vpop.permute.xlu0 %1407  ;;  %1047 = vrot.lane.b32.xlu1 %v1028_v12, %s2305_s16 }
 0x385   :  { %v1423_v5 = vmul.f32 0.0, %v2843_v4 }
 0x387   :  { %1440 = vrot.lane.b32.xlu0 %v1423_v5, %s2309_s3  ;;  %v772_v38 = vpop.permute.xlu2 %771  ;;  %v703_v34 = vpop.permute.xlu1 %702 }
 0x388   :  { %v714_v1 = vsel %vm712_vm4, %v2508_v50, %v703_v34  ;;  %v728_v42 = vadd.f32 %v703_v34, %v651_v55  ;;  %v783_v51 = vsel %vm781_vm6, %v2524_v57, %v772_v38  ;;  %v852_v50 = vsel %vm850_vm7, %v2552_v10, %v2738_v61 }
 0x389   :  { %v727_v29 = vadd.f32 %v714_v1, %v650_v39  ;;  %v3377_v10 = vmov 15   ;;  %v653_v1 = vmul.f32 %v2466_v18, %v2623_v6 }
 0x38a   :  { %v797_v53 = vadd.f32 %v772_v38, %v728_v42  ;;  %2243 = vset.pattern.permute.xlu2 %v3376_v2  ;;  %v1149_v38 = vmul.f32 0.0, %v2740_v27  ;;  %v652_v27 = vmul.f32 0.0, %v2466_v18  ;;  %v1026_v2 = vmul.f32 %v2716_v46, %v2601_v35 }
 0x38b   :  { %v796_v49 = vadd.f32 %v783_v51, %v727_v29  ;;  %1553 = vperm.xlu2 %2243, %v2788_v16   ;;  %v730_v42 = vadd.f32 %v2752_v28, %v653_v1  ;;  %v1217_v18 = vmul.f32 %v2809_v3, %v2615_v31  ;;  %v655_v46 = vmul.f32 %v2469_v23, %v2639_v0 }
 0x38c   :  { %1162 = vrot.lane.b32.xlu1 %v1146_v13, %s2274_s15  ;;  %v866_v12 = vadd.f32 %v2738_v61, %v797_v53 }
 0x38d   :  { %v865_v56 = vadd.f32 %v852_v50, %v796_v49  ;;  %v654_v50 = vmul.f32 0.0, %v2469_v23 }
 0x38f   :  { %982 = vrot.lane.b32.xlu0 %v961_v32, %s2295_s14  ;;  %v979_v57 = vpop.permute.xlu2 %978  ;;  %v910_v5 = vpop.permute.xlu1 %909 }
 0x390   :  { %v921_v55 = vsel %vm919_vm8, %v2603_v36, %v910_v5  ;;  %v935_v16 = vadd.f32 %v910_v5, %v866_v12  ;;  %v990_v40 = vsel %vm988_vm9, %v2704_v45, %v979_v57  ;;  %v715_v36 = vsel %vm712_vm4, %v2496_v43, %v2752_v28 }
 0x391   :  { %v934_v39 = vadd.f32 %v921_v55, %v865_v56  ;;  %v1491_v45 = vmul.f32 %v2770_v62, %v2601_v35  ;;  %v729_v29 = vadd.f32 %v715_v36, %v652_v27  ;;  %v1094_v55 = vmul.f32 %v2709_v52, %v2601_v35  ;;  %v2923_v52 = vpop.permute.xlu0 %1415 }
 0x392   :  { %v2872_v34 = vadd.f32 %v979_v57, %v935_v16  ;;  %v1285_v16 = vmul.f32 0.0, %v2755_v11  ;;  %v1147_v36 = vmul.f32 0.0, %v2718_v8  ;;  %v1353_v27 = vmul.f32 %v2767_v37, %v2601_v35 }
 0x393   :  { %2246 = vset.pattern.permute.xlu2 %v3377_v10  ;;  %v2875_v61 = vadd.f32 %v990_v40, %v934_v39  ;;  %v1215_v8 = vmul.f32 %v2730_v15, %v2601_v35  ;;  %v1424_v15 = vmul.f32 %v2779_v60, %v2615_v31 }
 0x394   :  { %1626 = vperm.xlu2 %2246, %v2806_v47   ;;  %1168 = vrot.lane.b32.xlu1 %v1149_v38, %s2274_s15 }
 0x397   :  { %1507 = vrot.lane.b32.xlu0 %v1491_v45, %s2310_s23  ;;  %v845_v13 = vpop.permute.xlu2 %844  ;;  %v776_v51 = vpop.permute.xlu1 %775  ;;  %v1561_v45 = vmul.f32 0.0, %v2813_v20 }
 0x398   :  { %v784_v43 = vsel %vm781_vm6, %v2526_v58, %v776_v51  ;;  %v799_v53 = vadd.f32 %v776_v51, %v730_v42  ;;  %v853_v28 = vsel %vm850_vm7, %v2560_v19, %v845_v13  ;;  %v1494_v58 = vmul.f32 0.0, %v2798_v30 }
 0x399   :  { %v798_v47 = vadd.f32 %v784_v43, %v729_v29  ;;  %v2940_v42 = vpop.permute.xlu0 %1557 }
 0x39a   :  { %v2897_v49 = vadd.f32 %v845_v13, %v799_v53  ;;  %v1356_v13 = vmul.f32 0.0, %v2757_v17  ;;  %v1218_v17 = vmul.f32 0.0, %v2809_v3 }
 0x39b   :  { %v2899_v32 = vadd.f32 %v853_v28, %v798_v47 }
 0x39c   :  { %1043 = vrot.lane.b32.xlu2 %v1026_v2, %s2305_s16  ;;  %1235 = vrot.lane.b32.xlu1 %v1217_v18, %s2284_s25 }
 0x39d   :  { %2249 = vset.pattern.permute.xlu2 %v3374_v33  ;;  %v785_v33 = vsel %vm781_vm6, %v2528_v59, %v2775_v14  ;;  %vm1957_vm6 = vcmask 1041409  }
 0x39f   :  { %1513 = vrot.lane.b32.xlu0 %v1494_v58, %s2310_s23  ;;  %v711_v19 = vpop.permute.xlu2 %710  ;;  %v849_v12 = vpop.permute.xlu1 %848  ;;  %v962_v58 = vmul.f32 0.0, %v2691_v63 }
 0x3a0   :  { %v716_v57 = vsel %vm712_vm4, %v2498_v44, %v711_v19  ;;  %v732_v56 = vadd.f32 %v711_v19, %v655_v46  ;;  %v854_v38 = vsel %vm850_vm7, %v2564_v24, %v849_v12  ;;  %v1031_v44 = vmul.f32 0.0, %v2695_v41 }
 0x3a1   :  { %v731_v5 = vadd.f32 %v716_v57, %v654_v50  ;;  %v1286_v46 = vmul.f32 %v2746_v7, %v2615_v31  ;;  %v1492_v57 = vmul.f32 0.0, %v2770_v62  ;;  %vm1949_vm4 = vcmask 130112  }
 0x3a2   :  { %v801_v23 = vadd.f32 %v2775_v14, %v732_v56  ;;  %vm1959_vm7 = vcmask 1042434  }
 0x3a3   :  { %v800_v39 = vadd.f32 %v785_v33, %v731_v5 }
 0x3a4   :  { %v870_v40 = vadd.f32 %v849_v12, %v801_v23  ;;  %1102 = vrot.lane.b32.xlu2 %v1094_v55, %s2306_s0  ;;  %1302 = vrot.lane.b32.xlu1 %v1285_v16, %s2307_s17  ;;  %v1354_v12 = vmul.f32 0.0, %v2767_v37  ;;  %v1029_v55 = vmul.f32 0.0, %v2783_v48  ;;  %v1422_v16 = vmul.f32 %v2843_v4, %v2601_v35 }
 0x3a5   :  { %v869_v11 = vadd.f32 %v854_v38, %v800_v39  ;;  %v2954_v43 = vpop.permute.xlu0 %1045  ;;  %v1221_v23 = vmul.f32 %v2823_v25, %v2639_v0  ;;  %v1032_v39 = vmul.f32 %v2695_v41, %v2639_v0  ;;  %v1425_v4 = vmul.f32 0.0, %v2779_v60 }
 0x3a6   :  { %v1562_v41 = vmul.f32 %v2801_v22, %v2615_v31 }
 0x3a7   :  { %1053 = vrot.lane.b32.xlu0 %v1031_v44, %s2305_s16  ;;  %v918_v10 = vpop.permute.xlu2 %917  ;;  %v2926_v59 = vpop.permute.xlu1 %1614 }
 0x3a8   :  { %v923_v14 = vsel %vm919_vm8, %v2590_v54, %v918_v10  ;;  %v2930_v1 = vadd.f32 %v918_v10, %v870_v40  ;;  %v1629_v51 = vmul.f32 %v2926_v59, %v2601_v35  ;;  %v963_v10 = vmul.f32 %v2691_v63, %v2639_v0 }
 0x3a9   :  { %v2932_v24 = vadd.f32 %v923_v14, %v869_v11  ;;  %v1493_v63 = vmul.f32 %v2798_v30, %v2615_v31  ;;  %v1096_v30 = vmul.f32 %v2791_v26, %v2623_v6 }
 0x3ac   :  { %1164 = vrot.lane.b32.xlu2 %v1147_v36, %s2274_s15  ;;  %1369 = vrot.lane.b32.xlu1 %v1353_v27, %s2308_s20 }
 0x3af   :  { %1578 = vrot.lane.b32.xlu0 %v1561_v45, %s2311_s24  ;;  %v2943_v54 = vpop.permute.xlu2 %1618  ;;  %v1630_v45 = vmul.f32 0.0, %v2926_v59  ;;  %v3378_v59 = vld [vmem:[#allocation7_spill] sm:$0xff] }
 0x3b0   :  { %v2945_v29 = vpop.permute.xlu1 %1091  ;;  %v1632_v2 = vmul.f32 0.0, %v2943_v54 }
 0x3b4   :  { %1231 = vrot.lane.b32.xlu2 %v1215_v8, %s2284_s25  ;;  %1375 = vrot.lane.b32.xlu1 %v1356_v13, %s2308_s20 }
 0x3b6   :  { %v2967_v18 = vpop.permute.xlu0 %1104 }
 0x3b7   :  { %1645 = vrot.lane.b32.xlu0 %v1629_v51, %s2312_s26 }
 0x3b8   :  { %v2957_v53 = vpop.permute.xlu2 %1139 }
 0x3b9   :  { %v2959_v47 = vpop.permute.xlu1 %1143  ;;  %v1150_v3 = vmul.f32 %v2957_v53, %v2623_v6 }
 0x3ba   :  { %v1153_v5 = vmul.f32 0.0, %v2959_v47 }
 0x3bc   :  { %1237 = vrot.lane.b32.xlu2 %v1218_v17, %s2284_s25  ;;  %1442 = vrot.lane.b32.xlu1 %v1424_v15, %s2309_s3  ;;  %v1030_v17 = vmul.f32 %v2783_v48, %v2623_v6 }
 0x3bf   :  { %1651 = vrot.lane.b32.xlu0 %v1632_v2, %s2312_s26  ;;  %v2982_v19 = vpop.permute.xlu0 %1166  ;;  %v3379_v2 = vld [vmem:[#allocation6_spill] sm:$0xff] }
 0x3c1   :  { %v2970_v28 = vpop.permute.xlu2 %1208 }
 0x3c2   :  { %v2975_v50 = vpop.permute.xlu1 %1277 }
 0x3c3   :  { %v1289_v40 = vmul.f32 0.0, %v2975_v50 }
 0x3c4   :  { %1304 = vrot.lane.b32.xlu2 %v1286_v46, %s2307_s17  ;;  %984 = vrot.lane.b32.xlu1 %v962_v58, %s2295_s14  ;;  %v989_v58 = vsel %vm988_vm9, %v3379_v2, %v3378_v59 }
 0x3c5   :  { %v1001_v48 = vadd.f32 %v989_v58, %v2841_v21  ;;  %v1560_v21 = vmul.f32 %v2813_v20, %v2601_v35  ;;  %v3381_v35 = vld [vmem:[#allocation4_spill] sm:$0xff] }
 0x3c7   :  { %1170 = vrot.lane.b32.xlu0 %v1150_v3, %s2274_s15  ;;  %v2997_v37 = vpop.permute.xlu0 %1233  ;;  %v1002_v3 = vadd.f32 %v3378_v59, %v2838_v9  ;;  %v3382_v59 = vld [vmem:[#allocation5_spill] sm:$0xff] }
 0x3ca   :  { %v2986_v56 = vpop.permute.xlu2 %1281 }
 0x3cb   :  { %v2988_v7 = vpop.permute.xlu1 %1346 }
 0x3cc   :  { %1371 = vrot.lane.b32.xlu2 %v1354_v12, %s2308_s20  ;;  %1509 = vrot.lane.b32.xlu1 %v1492_v57, %s2310_s23  ;;  %v1357_v60 = vmul.f32 %v2988_v7, %v2623_v6 }
 0x3cf   :  { %1176 = vrot.lane.b32.xlu0 %v1153_v5, %s2274_s15  ;;  %v3016_v44 = vpop.permute.xlu0 %1300 }
 0x3d3   :  { %v2999_v62 = vpop.permute.xlu2 %1350 }
 0x3d4   :  { %1438 = vrot.lane.b32.xlu2 %v1422_v16, %s2309_s3  ;;  %1049 = vrot.lane.b32.xlu1 %v1029_v55, %s2305_s16  ;;  %v3003_v33 = vpop.permute.xlu1 %1419  ;;  %v1360_v8 = vmul.f32 0.0, %v2999_v62 }
 0x3d5   :  { %v1428_v46 = vmul.f32 %v3003_v33, %v2639_v0 }
 0x3d7   :  { %1243 = vrot.lane.b32.xlu0 %v1221_v23, %s2284_s25  ;;  %v3033_v27 = vpop.permute.xlu0 %1306 }
 0x3dc   :  { %v3011_v38 = vpop.permute.xlu2 %1484  ;;  %1444 = vrot.lane.b32.xlu2 %v1425_v4, %s2309_s3  ;;  %1055 = vrot.lane.b32.xlu1 %v1032_v39, %s2305_s16 }
 0x3dd   :  { %v3018_v11 = vpop.permute.xlu1 %1488 }
 0x3df   :  { %1310 = vrot.lane.b32.xlu0 %v1289_v40, %s2307_s17  ;;  %v3045_v15 = vpop.permute.xlu0 %1373  ;;  %v1151_v40 = vmul.f32 0.0, %v2957_v53 }
 0x3e4   :  { %986 = vrot.lane.b32.xlu2 %v963_v10, %s2295_s14  ;;  %1580 = vrot.lane.b32.xlu1 %v1562_v41, %s2311_s24 }
 0x3e5   :  { %v3029_v14 = vpop.permute.xlu2 %1553 }
 0x3e6   :  { %v3031_v36 = vpop.permute.xlu1 %1622 }
 0x3e7   :  { %1377 = vrot.lane.b32.xlu0 %v1357_v60, %s2308_s20 }
 0x3ec   :  { %1511 = vrot.lane.b32.xlu2 %v1493_v63, %s2310_s23  ;;  %1647 = vrot.lane.b32.xlu1 %v1630_v45, %s2312_s26  ;;  %v3380_v45 = vld [vmem:[#allocation8_spill] sm:$0xff] }
 0x3ed   :  { %v922_v20 = vsel %vm919_vm8, %v3381_v35, %v3380_v45  ;;  %v937_v53 = vadd.f32 %v3380_v45, %v2897_v49  ;;  %v1564_v49 = vmul.f32 %v3029_v14, %v2623_v6  ;;  %vm1962_vm8 = vcmask 124928  }
 0x3ee   :  { %v3042_v13 = vpop.permute.xlu2 %1626  ;;  %v1042_v51 = vpop.permute.xlu1 %1041 }
 0x3ef   :  { %1383 = vrot.lane.b32.xlu0 %v1360_v8, %s2308_s20 }
 0x3f4   :  { %1051 = vrot.lane.b32.xlu2 %v1030_v17, %s2305_s16  ;;  %1106 = vrot.lane.b32.xlu1 %v1096_v30, %s2306_s0  ;;  %v1563_v17 = vmul.f32 0.0, %v2801_v22  ;;  %v1219_v30 = vmul.f32 %v2970_v28, %v2623_v6 }
 0x3f6   :  { %v1044_v12 = vpop.permute.xlu2 %1043  ;;  %v1048_v57 = vpop.permute.xlu1 %1047 }
 0x3f7   :  { %v1058_v26 = vsel %vm1057_vm10, %v1042_v51, %v1044_v12  ;;  %v1071_v5 = vadd.f32 %v1044_v12, %v1002_v3  ;;  %1450 = vrot.lane.b32.xlu0 %v1428_v46, %s2309_s3  ;;  %v1059_v55 = vsel %vm1057_vm10, %v2954_v43, %v1048_v57  ;;  %v1073_v16 = vadd.f32 %v1048_v57, %v2872_v34 }
 0x3f8   :  { %v1070_v23 = vadd.f32 %v1058_v26, %v1001_v48  ;;  %v1072_v39 = vadd.f32 %v1059_v55, %v2875_v61  ;;  %v1496_v43 = vmul.f32 0.0, %v3011_v38  ;;  %v936_v51 = vadd.f32 %v922_v20, %v2899_v32 }
 0x3f9   :  { %v1117_v4 = vadd.f32 %v2967_v18, %v1073_v16  ;;  %v3068_v9 = vpop.permute.xlu0 %1440  ;;  %v1222_v26 = vmul.f32 0.0, %v2823_v25  ;;  %v1567_v55 = vmul.f32 0.0, %v2940_v42 }
 0x3fa   :  { %v1116_v10 = vadd.f32 %v2967_v18, %v1072_v39 }
 0x3fc   :  { %1576 = vrot.lane.b32.xlu2 %v1560_v21, %s2311_s24  ;;  %1172 = vrot.lane.b32.xlu1 %v1151_v40, %s2274_s15  ;;  %v1193_v34 = vadd.f32 %v2982_v19, %v1116_v10 }
 0x3fe   :  { %v1103_v61 = vpop.permute.xlu2 %1102  ;;  %v1163_v41 = vpop.permute.xlu1 %1162 }
 0x3ff   :  { %v1114_v60 = vadd.f32 %v1103_v61, %v1070_v23  ;;  %v1115_v63 = vadd.f32 %v1103_v61, %v1071_v5  ;;  %1517 = vrot.lane.b32.xlu0 %v1496_v43, %s2310_s23  ;;  %v1631_v5 = vmul.f32 %v2943_v54, %v2615_v31  ;;  %v1097_v31 = vmul.f32 %v2945_v29, %v2639_v0 }
 0x400   :  { %v1290_v54 = vmul.f32 %v2986_v56, %v2639_v0 }
 0x401   :  { %v1191_v18 = vadd.f32 %v1163_v41, %v1114_v60  ;;  %v983_v8 = vpop.permute.xlu0 %982  ;;  %v1152_v60 = vmul.f32 %v2959_v47, %v2639_v0  ;;  %v1426_v47 = vmul.f32 %v2923_v52, %v2623_v6 }
 0x402   :  { %v991_v2 = vsel %vm988_vm9, %v3382_v59, %v983_v8  ;;  %v3090_v58 = vadd.f32 %v983_v8, %v937_v53  ;;  %v1429_v59 = vmul.f32 0.0, %v3003_v33 }
 0x403   :  { %v3092_v46 = vadd.f32 %v991_v2, %v936_v51 }
 0x404   :  { %1582 = vrot.lane.b32.xlu2 %v1563_v17, %s2311_s24  ;;  %1239 = vrot.lane.b32.xlu1 %v1219_v30, %s2284_s25  ;;  %v1288_v30 = vmul.f32 %v2975_v50, %v2623_v6 }
 0x406   :  { %v1165_v32 = vpop.permute.xlu2 %1164  ;;  %v1169_v3 = vpop.permute.xlu1 %1168 }
 0x407   :  { %v1179_v22 = vsel %vm187_vm5, %v1163_v41, %v1165_v32  ;;  %1584 = vrot.lane.b32.xlu0 %v1564_v49, %s2311_s24  ;;  %v1180_v12 = vsel %vm187_vm5, %v2982_v19, %v1169_v3  ;;  %v1291_v32 = vmul.f32 0.0, %v2986_v56  ;;  %v1497_v3 = vmul.f32 %v3018_v11, %v2639_v0 }
 0x408   :  { %v1192_v48 = vadd.f32 %v1179_v22, %v1115_v63  ;;  %v1194_v57 = vadd.f32 %v1180_v12, %v1117_v4  ;;  %v1358_v63 = vmul.f32 0.0, %v2988_v7  ;;  %v1220_v7 = vmul.f32 0.0, %v2970_v28 }
 0x409   :  { %v1359_v12 = vmul.f32 %v2999_v62, %v2639_v0  ;;  %v1633_v62 = vmul.f32 %v3031_v36, %v2623_v6 }
 0x40c   :  { %1649 = vrot.lane.b32.xlu2 %v1631_v5, %s2312_s26  ;;  %1245 = vrot.lane.b32.xlu1 %v1222_v26, %s2284_s25 }
 0x40e   :  { %v1232_v16 = vpop.permute.xlu2 %1231  ;;  %v1236_v23 = vpop.permute.xlu1 %1235 }
 0x40f   :  { %v1248_v39 = vsel %vm355_vm15, %v1232_v16, %v2997_v37  ;;  %v1260_v21 = vadd.f32 %v1232_v16, %v1191_v18  ;;  %1590 = vrot.lane.b32.xlu0 %v1567_v55, %s2311_s24  ;;  %v3111_v19 = vadd.f32 %v1236_v23, %v1193_v34  ;;  %v1635_v37 = vmul.f32 %v3042_v13, %v2639_v0  ;;  %v3122_v34 = vpop.permute.xlu0 %1507 }
 0x410   :  { %v1261_v25 = vadd.f32 %v1248_v39, %v1192_v48  ;;  %v1565_v48 = vmul.f32 0.0, %v3029_v14 }
 0x411   :  { %v1329_v4 = vadd.f32 %v3016_v44, %v1260_v21 }
 0x414   :  { %1312 = vrot.lane.b32.xlu1 %v1290_v54, %s2307_s17  ;;  %1108 = vrot.lane.b32.xlu2 %v1097_v31, %s2306_s0 }
 0x416   :  { %v1238_v40 = vpop.permute.xlu2 %1237  ;;  %v1303_v10 = vpop.permute.xlu1 %1302 }
 0x417   :  { %v1249_v43 = vsel %vm355_vm15, %v1236_v23, %v1238_v40  ;;  %1657 = vrot.lane.b32.xlu0 %v1635_v37, %s2312_s26  ;;  %v1317_v29 = vsel %vm1316_vm11, %v3016_v44, %v1303_v10  ;;  %v3142_v18 = vpop.permute.xlu0 %1513  ;;  %v1427_v23 = vmul.f32 0.0, %v2923_v52 }
 0x418   :  { %v1263_v61 = vadd.f32 %v1249_v43, %v1194_v57  ;;  %v1330_v41 = vadd.f32 %v1317_v29, %v1261_v25  ;;  %v1495_v25 = vmul.f32 %v3011_v38, %v2623_v6  ;;  %v1498_v6 = vmul.f32 0.0, %v3018_v11 }
 0x419   :  { %v1566_v29 = vmul.f32 %v2940_v42, %v2639_v0 }
 0x41c   :  { %1174 = vrot.lane.b32.xlu2 %v1152_v60, %s2274_s15  ;;  %1379 = vrot.lane.b32.xlu1 %v1358_v63, %s2308_s20 }
 0x41e   :  { %v3133_v45 = vpop.permute.xlu2 %1304  ;;  %v1370_v35 = vpop.permute.xlu1 %1369 }
 0x41f   :  { %v1318_v20 = vsel %vm1316_vm11, %v3133_v45, %v3033_v27  ;;  %v3138_v53 = vadd.f32 %v1370_v35, %v1329_v4  ;;  %v1054_v2 = vpop.permute.xlu0 %1053  ;;  %v1636_v4 = vmul.f32 0.0, %v3042_v13 }
 0x420   :  { %v3140_v44 = vadd.f32 %v1318_v20, %v1263_v61 }
 0x424   :  { %1241 = vrot.lane.b32.xlu2 %v1220_v7, %s2284_s25  ;;  %1446 = vrot.lane.b32.xlu1 %v1426_v47, %s2309_s3 }
 0x426   :  { %v1372_v8 = vpop.permute.xlu2 %1371  ;;  %v1376_v51 = vpop.permute.xlu1 %1375 }
 0x427   :  { %v1386_v27 = vsel %vm1385_vm12, %v1370_v35, %v1372_v8  ;;  %v3162_v22 = vpop.permute.xlu0 %1578  ;;  %v1634_v35 = vmul.f32 0.0, %v3031_v36 }
 0x428   :  { %v3150_v17 = vadd.f32 %v1386_v27, %v1330_v41 }
 0x42c   :  { %1308 = vrot.lane.b32.xlu2 %v1288_v30, %s2307_s17  ;;  %1452 = vrot.lane.b32.xlu1 %v1429_v59, %s2309_s3 }
 0x42e   :  { %v1439_v28 = vpop.permute.xlu2 %1438  ;;  %v1443_v49 = vpop.permute.xlu1 %1442 }
 0x42f   :  { %v1646_v26 = vpop.permute.xlu0 %1645  ;;  %v1467_v61 = vadd.f32 %v1439_v28, %v3138_v53  ;;  %v1455_v63 = vsel %vm1454_vm13, %v1439_v28, %v3068_v9 }
 0x430   :  { %v1468_v9 = vadd.f32 %v1455_v63, %v3150_v17 }
 0x434   :  { %1314 = vrot.lane.b32.xlu2 %v1291_v32, %s2307_s17  ;;  %1519 = vrot.lane.b32.xlu1 %v1497_v3, %s2310_s23 }
 0x436   :  { %v1445_v50 = vpop.permute.xlu2 %1444  ;;  %v985_v33 = vpop.permute.xlu1 %984 }
 0x437   :  { %v1652_v21 = vpop.permute.xlu0 %1651  ;;  %v1456_v42 = vsel %vm1454_vm13, %v1443_v49, %v1445_v50 }
 0x43c   :  { %1381 = vrot.lane.b32.xlu2 %v1359_v12, %s2308_s20  ;;  %1586 = vrot.lane.b32.xlu1 %v1565_v48, %s2311_s24 }
 0x43e   :  { %v987_v56 = vpop.permute.xlu2 %986  ;;  %v1510_v57 = vpop.permute.xlu1 %1509 }
 0x43f   :  { %v992_v5 = vsel %vm988_vm9, %v985_v33, %v987_v56  ;;  %v1008_v55 = vadd.f32 %v987_v56, %v2930_v1  ;;  %v1171_v38 = vpop.permute.xlu0 %1170  ;;  %v1524_v53 = vsel %vm1523_vm14, %v3122_v34, %v1510_v57  ;;  %vm1987_vm9 = vcmask 7168  }
 0x440   :  { %v1007_v16 = vadd.f32 %v992_v5, %v2932_v24  ;;  %v1537_v27 = vadd.f32 %v1524_v53, %v1468_v9 }
 0x444   :  { %1448 = vrot.lane.b32.xlu2 %v1427_v23, %s2309_s3  ;;  %1653 = vrot.lane.b32.xlu1 %v1633_v62, %s2312_s26 }
 0x446   :  { %v1512_v14 = vpop.permute.xlu2 %1511  ;;  %v1050_v39 = vpop.permute.xlu1 %1049 }
 0x447   :  { %v1177_v11 = vpop.permute.xlu0 %1176  ;;  %v1525_v47 = vsel %vm1523_vm14, %v1512_v14, %v3142_v18 }
 0x44c   :  { %1515 = vrot.lane.b32.xlu2 %v1495_v25, %s2310_s23  ;;  %1659 = vrot.lane.b32.xlu1 %v1636_v4, %s2312_s26 }
 0x44e   :  { %v1052_v52 = vpop.permute.xlu2 %1051  ;;  %v1056_v1 = vpop.permute.xlu1 %1055 }
 0x44f   :  { %v1060_v24 = vsel %vm1057_vm10, %v1050_v39, %v1052_v52  ;;  %v1075_v31 = vadd.f32 %v1052_v52, %v3090_v58  ;;  %v1061_v54 = vsel %vm1057_vm10, %v1054_v2, %v1056_v1  ;;  %v1077_v37 = vadd.f32 %v1056_v1, %v1008_v55 }
 0x450   :  { %v1074_v40 = vadd.f32 %v1060_v24, %v3092_v46  ;;  %v3186_v10 = vadd.f32 %v1061_v54, %v1007_v16  ;;  %v1331_v58 = vadd.f32 %v3133_v45, %v3111_v19  ;;  %v1387_v46 = vsel %vm1385_vm12, %v3045_v15, %v1376_v51 }
 0x451   :  { %v1401_v19 = vadd.f32 %v1387_v46, %v3140_v44  ;;  %v1536_v45 = vadd.f32 %v3122_v34, %v1467_v61  ;;  %v2146_v61 = vld [vmem:[%s3358_s4 + $0x38] sm:$0xff]  ;;  %vm1989_vm10 = vcmask 10240  }
 0x452   :  { %v1400_v0 = vadd.f32 %v3045_v15, %v1331_v58  ;;  %1766 = vmatpush.bf16.msra.mxu2 %v2146_v61 }
 0x453   :  { %v1470_v7 = vadd.f32 %v1456_v42, %v1401_v19  ;;  %v2144_v42 = vld [vmem:[%s3358_s4 + $0x28] sm:$0xff] }
 0x454   :  { %1521 = vrot.lane.b32.xlu2 %v1498_v6, %s2310_s23  ;;  %v1469_v20 = vadd.f32 %v1443_v49, %v1400_v0  ;;  %v1244_v49 = vpop.permute.xlu0 %1243 }
 0x455   :  { %v1539_v36 = vadd.f32 %v1525_v47, %v1470_v7 }
 0x456   :  { %v1577_v13 = vpop.permute.xlu2 %1576  ;;  %v1581_v43 = vpop.permute.xlu1 %1580  ;;  %v1538_v8 = vadd.f32 %v1512_v14, %v1469_v20  ;;  %v2143_v20 = vld [vmem:[%s3358_s4 + $0x20] sm:$0xff] }
 0x457   :  { %v1605_v15 = vadd.f32 %v1577_v13, %v1536_v45  ;;  %v1593_v44 = vsel %vm1592_vm0, %v1577_v13, %v3162_v22 }
 0x458   :  { %v1607_v30 = vadd.f32 %v1581_v43, %v1538_v8  ;;  %v1606_v59 = vadd.f32 %v1593_v44, %v1537_v27  ;;  %v2142_v8 = vld [vmem:[%s3358_s4 + $0x18] sm:$0xff] }
 0x459   :  { %v1674_v18 = vadd.f32 %v1646_v26, %v1605_v15 }
 0x45c   :  { %1588 = vrot.lane.b32.xlu2 %v1566_v29, %s2311_s24  ;;  %v1311_v62 = vpop.permute.xlu0 %1310 }
 0x45e   :  { %v1583_v41 = vpop.permute.xlu2 %1582  ;;  %v1648_v60 = vpop.permute.xlu1 %1647 }
 0x45f   :  { %v1594_v51 = vsel %vm1592_vm0, %v1581_v43, %v1583_v41  ;;  %v1662_v34 = vsel %vm1661_vm1, %v1646_v26, %v1648_v60 }
 0x460   :  { %v1608_v2 = vadd.f32 %v1594_v51, %v1539_v36  ;;  %v1675_v33 = vadd.f32 %v1662_v34, %v1606_v59 }
 0x464   :  { %1655 = vrot.lane.b32.xlu2 %v1634_v35, %s2312_s26  ;;  %v1378_v4 = vpop.permute.xlu0 %1377 }
 0x466   :  { %v1650_v17 = vpop.permute.xlu2 %1649  ;;  %v1107_v28 = vpop.permute.xlu1 %1106 }
 0x467   :  { %v1663_v32 = vsel %vm1661_vm1, %v1650_v17, %v1652_v21  ;;  %v1676_v3 = vadd.f32 %v1650_v17, %v1607_v30  ;;  %v1118_v50 = vadd.f32 %v1107_v28, %v1074_v40  ;;  %v1119_v22 = vadd.f32 %v1107_v28, %v1075_v31 }
 0x468   :  { %v1677_v12 = vadd.f32 %v1663_v32, %v1608_v2 }
 0x469   :  { %v1682_v48 = vpack.c.bf16 %v1676_v3, %v1674_v18  ;;  %v1195_v56 = vadd.f32 %v1171_v38, %v1118_v50  ;;  %v2141_v18 = vld [vmem:[%s3358_s4 + $0x10] sm:$0xff] }
 0x46a   :  { %v1683_v57 = vpack.c.bf16 %v1677_v12, %v1675_v33 }
 0x46c   :  { %1706 = vrot.lane.b32.xlu2 %v1682_v48, %s2284_s25  ;;  %1708 = vrot.lane.b32.xlu0 %v1683_v57, %s2284_s25  ;;  %v1384_v24 = vpop.permute.xlu0 %1383 }
 0x46e   :  { %v1109_v5 = vpop.permute.xlu2 %1108  ;;  %v1173_v26 = vpop.permute.xlu1 %1172 }
 0x46f   :  { %v1121_v55 = vadd.f32 %v1109_v5, %v1077_v37  ;;  %v1181_v16 = vsel %vm187_vm5, %v1171_v38, %v1173_v26  ;;  %v1120_v41 = vadd.f32 %v1109_v5, %v3186_v10  ;;  %v2140_v5 = vld [vmem:[%s3358_s4 + $0x8] sm:$0xff] }
 0x470   :  { %v1196_v23 = vadd.f32 %v1181_v16, %v1119_v22 }
 0x474   :  { %v1451_v13 = vpop.permute.xlu0 %1450 }
 0x476   :  { %v1175_v14 = vpop.permute.xlu2 %1174  ;;  %v1240_v39 = vpop.permute.xlu1 %1239 }
 0x477   :  { %v1182_v21 = vsel %vm187_vm5, %v1175_v14, %v1177_v11  ;;  %v2145_v11 = vld [vmem:[%s3358_s4 + $0x30] sm:$0xff]  ;;  %v1197_v0 = vadd.f32 %v1175_v14, %v1120_v41  ;;  %v1264_v19 = vadd.f32 %v1240_v39, %v1195_v56 }
 0x478   :  { %v1198_v25 = vadd.f32 %v1182_v21, %v1121_v55  ;;  %1767 = vmatpush.bf16.msra.mxu2 %v2145_v11 }
 0x479   :  { %v1266_v35 = vadd.f32 %v1244_v49, %v1197_v0 }
 0x47c   :  { %v1518_v29 = vpop.permute.xlu0 %1517  ;;  %1768 = vmatpush.bf16.msra.mxu2 %v2144_v42 }
 0x47e   :  { %v1242_v52 = vpop.permute.xlu2 %1241  ;;  %v1246_v1 = vpop.permute.xlu1 %1245 }
 0x47f   :  { %v1250_v44 = vsel %vm355_vm15, %v1240_v39, %v1242_v52  ;;  %v1251_v51 = vsel %vm355_vm15, %v1244_v49, %v1246_v1 }
 0x480   :  { %1769 = vmatpush.bf16.msra.mxu2 %v2143_v20  ;;  %v1265_v2 = vadd.f32 %v1250_v44, %v1196_v23  ;;  %v1267_v17 = vadd.f32 %v1251_v51, %v1198_v25 }
 0x484   :  { %v1585_v46 = vpop.permute.xlu0 %1584  ;;  %1770 = vmatpush.bf16.msra.mxu2 %v2142_v8  ;;  %v1788_v8 = vld [vmem:[%s3359_s5 + $0x18] sm:$0xff] }
 0x486   :  { %v1309_v31 = vpop.permute.xlu2 %1308  ;;  %v1313_v54 = vpop.permute.xlu1 %1312 }
 0x487   :  { %v1333_v45 = vadd.f32 %v1309_v31, %v1264_v19  ;;  %v1335_v47 = vadd.f32 %v1313_v54, %v1266_v35  ;;  %v1319_v36 = vsel %vm1316_vm11, %v1309_v31, %v1311_v62  ;;  %v1789_v35 = vld [vmem:[%s3355_s2] sm:$0xff] }
 0x488   :  { %v1334_v49 = vadd.f32 %v1319_v36, %v1265_v2  ;;  %1771 = vmatpush.bf16.msra.mxu2 %v2141_v18  ;;  %1795 = vperm.xlu0 %2247, %v1789_v35  }
 0x489   :  { %v1402_v15 = vadd.f32 %v1378_v4, %v1333_v45 }
 0x48c   :  { %v1591_v53 = vpop.permute.xlu0 %1590  ;;  %1772 = vmatpush.bf16.msra.mxu2 %v2140_v5 }
 0x48e   :  { %v1315_v40 = vpop.permute.xlu2 %1314  ;;  %v1380_v6 = vpop.permute.xlu1 %1379 }
 0x48f   :  { %v1320_v30 = vsel %vm1316_vm11, %v1313_v54, %v1315_v40  ;;  %v1388_v28 = vsel %vm1385_vm12, %v1378_v4, %v1380_v6 }
 0x490   :  { %v1336_v50 = vadd.f32 %v1320_v30, %v1267_v17  ;;  %v1403_v55 = vadd.f32 %v1388_v28, %v1334_v49  ;;  %v1886_v49 = vld [vmem:[%s3360_s6 + $0x40] sm:$0xff] }
 0x494   :  { %v1658_v26 = vpop.permute.xlu0 %1657 }
 0x496   :  { %v1382_v43 = vpop.permute.xlu2 %1381  ;;  %v1447_v37 = vpop.permute.xlu1 %1446 }
 0x497   :  { %v1404_v7 = vadd.f32 %v1382_v43, %v1335_v47  ;;  %v1471_v27 = vadd.f32 %v1447_v37, %v1402_v15  ;;  %v1389_v32 = vsel %vm1385_vm12, %v1382_v43, %v1384_v24  ;;  %v2139_v24 = vld [vmem:[%s3358_s4] sm:$0xff]  ;;  %v1791_v47 = vld [vmem:[%s3355_s2 + $0x10] sm:$0xff] }
 0x498   :  { %v1405_v16 = vadd.f32 %v1389_v32, %v1336_v50  ;;  %1773 = vmatpush.bf16.msra.mxu2 %v2139_v24  ;;  %v1787_v15 = vld [vmem:[%s3359_s5 + $0x10] sm:$0xff]  ;;  %v1878_v50 = vld [vmem:[%s3360_s6] sm:$0xff] }
 0x499   :  { %v1473_v59 = vadd.f32 %v1451_v13, %v1404_v7  ;;  %v1786_v7 = vld [vmem:[%s3359_s5 + $0x8] sm:$0xff] }
 0x49e   :  { %v1449_v38 = vpop.permute.xlu2 %1448  ;;  %v1453_v58 = vpop.permute.xlu1 %1452 }
 0x49f   :  { %v1457_v12 = vsel %vm1454_vm13, %v1447_v37, %v1449_v38  ;;  %v1458_v48 = vsel %vm1454_vm13, %v1451_v13, %v1453_v58 }
 0x4a0   :  { %v1472_v21 = vadd.f32 %v1457_v12, %v1403_v55  ;;  %v1474_v25 = vadd.f32 %v1458_v48, %v1405_v16  ;;  %v1882_v55 = vld [vmem:[%s3360_s6 + $0x20] sm:$0xff] }
 0x4a6   :  { %v1516_v60 = vpop.permute.xlu2 %1515  ;;  %v1520_v63 = vpop.permute.xlu1 %1519 }
 0x4a7   :  { %v1540_v34 = vadd.f32 %v1516_v60, %v1471_v27  ;;  %v1542_v3 = vadd.f32 %v1520_v63, %v1473_v59  ;;  %v1526_v23 = vsel %vm1523_vm14, %v1516_v60, %v1518_v29 }
 0x4a8   :  { %v1541_v31 = vadd.f32 %v1526_v23, %v1472_v21 }
 0x4a9   :  { %v1609_v57 = vadd.f32 %v1585_v46, %v1540_v34 }
 0x4ae   :  { %v1522_v9 = vpop.permute.xlu2 %1521  ;;  %v1587_v10 = vpop.permute.xlu1 %1586 }
 0x4af   :  { %v1527_v62 = vsel %vm1523_vm14, %v1520_v63, %v1522_v9  ;;  %v1595_v4 = vsel %vm1592_vm0, %v1585_v46, %v1587_v10  ;;  %v1785_v9 = vld [vmem:[%s3359_s5] sm:$0xff]  ;;  %v1792_v10 = vld [vmem:[%s3355_s2 + $0x18] sm:$0xff] }
 0x4b0   :  { %v1543_v54 = vadd.f32 %v1527_v62, %v1474_v25  ;;  %v1610_v40 = vadd.f32 %v1595_v4, %v1541_v31 }
 0x4b6   :  { %v1589_v22 = vpop.permute.xlu2 %1588  ;;  %v1654_v33 = vpop.permute.xlu1 %1653 }
 0x4b7   :  { %v1611_v56 = vadd.f32 %v1589_v22, %v1542_v3  ;;  %v1678_v39 = vadd.f32 %v1654_v33, %v1609_v57  ;;  %v1596_v52 = vsel %vm1592_vm0, %v1589_v22, %v1591_v53  ;;  %v1790_v53 = vld [vmem:[%s3355_s2 + $0x8] sm:$0xff] }
 0x4b8   :  { %v1612_v6 = vadd.f32 %v1596_v52, %v1543_v54 }
 0x4b9   :  { %v1680_v14 = vadd.f32 %v1658_v26, %v1611_v56 }
 0x4bb   :  { %v1684_v1 = vpack.c.bf16 %v1680_v14, %v1678_v39  ;;  %v1879_v14 = vld [vmem:[%s3360_s6 + $0x8] sm:$0xff] }
 0x4bd   :  { %1710 = vrot.lane.b32.xlu1 %v1684_v1, %s2284_s25 }
 0x4be   :  { %v1656_v13 = vpop.permute.xlu2 %1655  ;;  %v1660_v43 = vpop.permute.xlu1 %1659 }
 0x4bf   :  { %v1664_v37 = vsel %vm1661_vm1, %v1654_v33, %v1656_v13  ;;  %v1665_v29 = vsel %vm1661_vm1, %v1658_v26, %v1660_v43 }
 0x4c0   :  { %v1679_v38 = vadd.f32 %v1664_v37, %v1610_v40  ;;  %v1681_v58 = vadd.f32 %v1665_v29, %v1612_v6  ;;  %v1883_v40 = vld [vmem:[%s3360_s6 + $0x28] sm:$0xff]  ;;  %v1880_v37 = vld [vmem:[%s3360_s6 + $0x10] sm:$0xff] }
 0x4c2   :  { %v1685_v61 = vpack.c.bf16 %v1681_v58, %v1679_v38 }
 0x4c4   :  { %1712 = vrot.lane.b32.xlu2 %v1685_v61, %s2284_s25 }
 0x4c5   :  { %1800 = vperm.xlu1 %2248, %v1790_v53  }
 0x4c6   :  { %v1707_v46 = vpop.permute.xlu2 %1706 }
 0x4cc   :  { %1805 = vperm.xlu2 %2249, %v1791_v47  }
 0x4cd   :  { %1810 = vperm.xlu1 %2248, %v1792_v10   ;;  %v1885_v10 = vld [vmem:[%s3360_s6 + $0x38] sm:$0xff] }
 0x4de   :  { %v1709_v11 = vpop.permute.xlu0 %1708 }
 0x4df   :  { %v1714_v41 = vsel %vm355_vm15, %v1707_v46, %v1709_v11  ;;  %v1884_v11 = vld [vmem:[%s3360_s6 + $0x30] sm:$0xff] }
 0x4e0   :  { %1774 = vmatmul.bf16.vlgmr.msra.gmra.mxu2 %v1714_v41 }
 0x4fa   :  { %v1796_v44 = vpop.permute.xlu0 %1795 }
 0x51e   :  { %v1713_v60 = vpop.permute.xlu2 %1712 }
 0x526   :  { %v1806_v3 = vpop.permute.xlu2 %1805 }
 0x52f   :  { %v1711_v63 = vpop.permute.xlu1 %1710 }
 0x530   :  { %v1715_v0 = vsel %vm355_vm15, %v1711_v63, %v1713_v60  ;;  %v1889_v63 = vld [vmem:[%s3360_s6 + $0x58] sm:$0xff] }
 0x531   :  { %1779 = vmatmul.bf16.gmra.mxu2 %v1715_v0  ;;  %v1881_v0 = vld [vmem:[%s3360_s6 + $0x18] sm:$0xff] }
 0x537   :  { %v1801_v34 = vpop.permute.xlu1 %1800 }
 0x53f   :  { %v1811_v25 = vpop.permute.xlu1 %1810 }
 0x563   :  { %v1775_v42 = vpop.f32.mrf.mxu2 }
 0x56b   :  { %v1777_v19 = vpop.f32.mrf.mxu2 }
 0x5b4   :  { %v1780_v45 = vpop.f32.mrf.mxu2 }
 0x5bc   :  { %v1782_v20 = vpop.f32.mrf.mxu2 }
 0x5bd   :  { %1837 = vmatpush.msra.mxu3 %v1782_v20 }
 0x5bf   :  { %1838 = vmatpush.msra.mxu3 %v1780_v45 }
 0x5c1   :  { %1839 = vmatpush.msra.mxu3 %v1777_v19 }
 0x5c3   :  { %1840 = vmatpush.msra.mxu3 %v1775_v42 }
 0x5c4   :  { %2111 = vmatmul.msk.f32.vlgmr.msra.gmra.mxu3 %vm1454_vm13, %v1785_v9  ;;  %v1887_v9 = vld [vmem:[%s3360_s6 + $0x48] sm:$0xff] }
 0x5cc   :  { %2112 = vmatmul.msk.f32.gmra.mxu3 %vm1454_vm13, %v1786_v7 }
 0x5d4   :  { %2113 = vmatmul.msk.f32.gmra.mxu3 %vm1454_vm13, %v1787_v15 }
 0x5dc   :  { %2114 = vmatmul.msk.f32.gmra.mxu3 %vm1454_vm13, %v1788_v8 }
 0x647   :  { %v1842_v51 = vpop.f32.mrf.mxu3 }
 0x648   :  { %v1843_v27 = vadd.f32 %v1842_v51, %v1796_v44  ;;  %v1888_v51 = vld [vmem:[%s3360_s6 + $0x50] sm:$0xff] }
 0x64a   :  { %v1858_v36 = vmin.f32 %v1843_v27, 0.0  ;;  %vm1854_vm5 = vcmp.gt.f32.partialorder %v1843_v27, 0.0 }
 0x64c   :  { %v1862_v30 = vmul.f32 1.442695, %v1858_v36 }
 0x64e   :  { %2258 = vpow2.f32 %v1862_v30 }
 0x64f   :  { %v1845_v59 = vpop.f32.mrf.mxu3 }
 0x650   :  { %v1846_v18 = vadd.f32 %v1845_v59, %v1801_v34 }
 0x652   :  { %v1859_v2 = vmin.f32 %v1846_v18, 0.0  ;;  %vm1855_vm15 = vcmp.gt.f32.partialorder %v1846_v18, 0.0 }
 0x654   :  { %v2259_v17 = vpop.eup %2258  ;;  %v1864_v28 = vmul.f32 1.442695, %v1859_v2 }
 0x655   :  { %v2115_v32 = vadd.f32 -1.0, %v2259_v17  ;;  %v1944_v17 = vlaneseq }
 0x656   :  { %2260 = vpow2.f32 %v1864_v28 }
 0x657   :  { %v1874_v22 = vsel %vm1854_vm5, %v1843_v27, %v2115_v32  ;;  %v1848_v33 = vpop.f32.mrf.mxu3  ;;  %v1945_v28 = vand.u32 127, %v1944_v17 }
 0x658   :  { %v1849_v12 = vadd.f32 %v1848_v33, %v1806_v3  ;;  %v1898_v48 = vmul.f32 %v1886_v49, %v1874_v22  ;;  %v1890_v56 = vmul.f32 %v1878_v50, %v1874_v22  ;;  %v1894_v39 = vmul.f32 %v1882_v55, %v1874_v22 }
 0x659   :  { %v1947_v50 = vadd.s32 4294967288, %v1945_v28 }
 0x65a   :  { %v1860_v57 = vmin.f32 %v1849_v12, 0.0  ;;  %v1926_v5 = vsel %vm1592_vm0, %v1898_v48, 0.0  ;;  %v1902_v26 = vsel %vm1592_vm0, %v1890_v56, 0.0  ;;  %v1914_v31 = vsel %vm1592_vm0, %v1894_v39, 0.0 }
 0x65b   :  { %1927 = vadd.xlane.f32.xlu0 %v1926_v5  ;;  %1903 = vadd.xlane.f32.xlu2 %v1902_v26  ;;  %vm1856_vm2 = vcmp.gt.f32.partialorder %v1849_v12, 0.0 }
 0x65c   :  { %v2261_v16 = vpop.eup %2260  ;;  %v1866_v23 = vmul.f32 1.442695, %v1860_v57 }
 0x65d   :  { %v2116_v62 = vadd.f32 -1.0, %v2261_v16 }
 0x65e   :  { %2262 = vpow2.f32 %v1866_v23 }
 0x65f   :  { %v1875_v21 = vsel %vm1855_vm15, %v1846_v18, %v2116_v62  ;;  %v1851_v4 = vpop.f32.mrf.mxu3 }
 0x660   :  { %v1852_v52 = vadd.f32 %v1851_v4, %v1811_v25  ;;  %v1891_v1 = vmul.f32 %v1879_v14, %v1875_v21  ;;  %v1895_v29 = vmul.f32 %v1883_v40, %v1875_v21  ;;  %v1899_v7 = vmul.f32 %v1887_v9, %v1875_v21 }
 0x662   :  { %v1861_v24 = vmin.f32 %v1852_v52, 0.0  ;;  %v1905_v54 = vsel %vm1592_vm0, %v1891_v1, 0.0  ;;  %v1917_v46 = vsel %vm1592_vm0, %v1895_v29, 0.0  ;;  %vm1857_vm3 = vcmp.gt.f32.partialorder %v1852_v52, 0.0 }
 0x663   :  { %1915 = vadd.xlane.f32.xlu2 %v1914_v31  ;;  %1906 = vadd.xlane.f32.xlu0 %v1905_v54  ;;  %v1929_v8 = vsel %vm1592_vm0, %v1899_v7, 0.0 }
 0x664   :  { %v2263_v6 = vpop.eup %2262  ;;  %v1868_v13 = vmul.f32 1.442695, %v1861_v24 }
 0x665   :  { %v2117_v43 = vadd.f32 -1.0, %v2263_v6 }
 0x666   :  { %2264 = vpow2.f32 %v1868_v13 }
 0x667   :  { %v1876_v38 = vsel %vm1856_vm2, %v1849_v12, %v2117_v43 }
 0x668   :  { %v1892_v58 = vmul.f32 %v1880_v37, %v1876_v38  ;;  %v1896_v42 = vmul.f32 %v1884_v11, %v1876_v38  ;;  %v1900_v27 = vmul.f32 %v1888_v51, %v1876_v38 }
 0x66a   :  { %v1908_v61 = vsel %vm1592_vm0, %v1892_v58, 0.0  ;;  %v1920_v20 = vsel %vm1592_vm0, %v1896_v42, 0.0  ;;  %v1932_v36 = vsel %vm1592_vm0, %v1900_v27, 0.0 }
 0x66b   :  { %1909 = vadd.xlane.f32.xlu1 %v1908_v61  ;;  %1918 = vadd.xlane.f32.xlu0 %v1917_v46 }
 0x66c   :  { %v2265_v41 = vpop.eup %2264 }
 0x66d   :  { %v2118_v60 = vadd.f32 -1.0, %v2265_v41 }
 0x66f   :  { %v1877_v19 = vsel %vm1857_vm3, %v1852_v52, %v2118_v60 }
 0x670   :  { %v1901_v45 = vmul.f32 %v1889_v63, %v1877_v19  ;;  %v1893_v35 = vmul.f32 %v1881_v0, %v1877_v19  ;;  %v1897_v15 = vmul.f32 %v1885_v10, %v1877_v19 }
 0x672   :  { %v1935_v53 = vsel %vm1592_vm0, %v1901_v45, 0.0  ;;  %v1911_v47 = vsel %vm1592_vm0, %v1893_v35, 0.0  ;;  %v1923_v44 = vsel %vm1592_vm0, %v1897_v15, 0.0 }
 0x673   :  { %1921 = vadd.xlane.f32.xlu1 %v1920_v20  ;;  %1936 = vadd.xlane.f32.xlu0 %v1935_v53 }
 0x674   :  { %1912 = vadd.xlane.f32.xlu2 %v1911_v47 }
 0x67b   :  { %1930 = vadd.xlane.f32.xlu1 %v1929_v8 }
 0x67c   :  { %1924 = vadd.xlane.f32.xlu2 %v1923_v44 }
 0x684   :  { %1933 = vadd.xlane.f32.xlu2 %v1932_v36 }
 0x6ce   :  { %v1928_v30 = vpop.xlane.xlu0 %1927  ;;  %v1904_v34 = vpop.xlane.xlu2 %1903 }
 0x6cf   :  { %v1946_v48 = vperm.slane %v1904_v34, %v1945_v28  ;;  %v1954_v5 = vperm.slane %v1928_v30, %v1945_v28 }
 0x6d6   :  { %v1907_v59 = vpop.xlane.xlu0 %1906  ;;  %v1916_v2 = vpop.xlane.xlu2 %1915 }
 0x6d7   :  { %v1951_v33 = vperm.slane %v1916_v2, %v1945_v28  ;;  %v1948_v12 = vperm.slane %v1907_v59, %v1947_v50 }
 0x6d9   :  { %v1950_v16 = vsel %vm1949_vm4, %v1948_v12, %v1946_v48 }
 0x6de   :  { %v1910_v18 = vpop.xlane.xlu1 %1909  ;;  %v1919_v3 = vpop.xlane.xlu0 %1918 }
 0x6df   :  { %v1952_v22 = vperm.slane %v1919_v3, %v1947_v50  ;;  %v1972_v1 = vperm.slane %v1910_v18, %v1945_v28 }
 0x6e1   :  { %v1953_v56 = vsel %vm1949_vm4, %v1952_v22, %v1951_v33 }
 0x6e2   :  { %v1958_v62 = vsel %vm1957_vm6, %v1953_v56, %v1950_v16 }
 0x6e6   :  { %v1922_v32 = vpop.xlane.xlu1 %1921  ;;  %v1937_v25 = vpop.xlane.xlu0 %1936 }
 0x6e7   :  { %v1913_v49 = vpop.xlane.xlu2 %1912  ;;  %v1975_v52 = vperm.slane %v1922_v32, %v1945_v28  ;;  %v1979_v54 = vperm.slane %v1937_v25, %v1947_v50 }
 0x6e8   :  { %v1973_v4 = vperm.slane %v1913_v49, %v1947_v50 }
 0x6ea   :  { %v1974_v6 = vsel %vm1949_vm4, %v1973_v4, %v1972_v1 }
 0x6ee   :  { %v1931_v57 = vpop.xlane.xlu1 %1930 }
 0x6ef   :  { %v1925_v26 = vpop.xlane.xlu2 %1924  ;;  %v1955_v55 = vperm.slane %v1931_v57, %v1947_v50 }
 0x6f0   :  { %v1976_v39 = vperm.slane %v1925_v26, %v1947_v50 }
 0x6f1   :  { %v1956_v23 = vsel %vm1949_vm4, %v1955_v55, %v1954_v5 }
 0x6f2   :  { %v1960_v14 = vsel %vm1959_vm7, %v1956_v23, %v1958_v62  ;;  %v1977_v24 = vsel %vm1949_vm4, %v1976_v39, %v1975_v52 }
 0x6f3   :  { %v1963_v21 = vsel %vm1962_vm8, %v1960_v14, 0.0  ;;  %v1981_v43 = vsel %vm1957_vm6, %v1977_v24, %v1974_v6 }
 0x6f4   :  { %1964 = vadd.xlane.f32.xlu1 %v1963_v21 }
 0x6f7   :  { %v1934_v31 = vpop.xlane.xlu2 %1933 }
 0x6f8   :  { %v1978_v40 = vperm.slane %v1934_v31, %v1945_v28 }
 0x6fa   :  { %v1980_v13 = vsel %vm1949_vm4, %v1979_v54, %v1978_v40 }
 0x6fb   :  { %v1982_v37 = vsel %vm1959_vm7, %v1980_v13, %v1981_v43 }
 0x6fc   :  { %v1984_v29 = vsel %vm1962_vm8, %v1982_v37, 0.0 }
 0x6fd   :  { %1985 = vadd.xlane.f32.xlu2 %v1984_v29 }
 0x767   :  { %v1965_v38 = vpop.xlane.xlu1 %1964 }
 0x770   :  { %v1986_v58 = vpop.xlane.xlu2 %1985 }
 0x771   :  { %v1988_v61 = vsel %vm1987_vm9, %v1965_v38, %v1986_v58 }
 0x772   :  { %1990 = vst.msk [vmem:[%s3361_s7] sm:$0x7] %vm1989_vm10, %v1988_v61 }

</bundles_post_ra>
